<compile_context>
chip_gen: v7x
topology: tpu7x:2x2x1
jax: 0.10.0
libtpu: 0.0.40
codegen_flags: <defaults>
</compile_context>

<pallas_src>
import jax
import jax.numpy as jnp
from jax.experimental import pallas as pl
from jax.experimental.pallas import tpu as pltpu


def _round_up(x, m):
    return ((x + m - 1) // m) * m


def make_mlp_kernel(num_layers):
    """Kernel factory: fused MLP with `num_layers` Linear layers, ReLU between them."""

    def kernel(x_ref, *refs):
        out_ref = refs[-1]
        wb_refs = refs[:-1]
        z = x_ref[...]  # bf16 (or f32) activations, (tile_b, in_dim)
        for l in range(num_layers):
            w = wb_refs[2 * l][...]          # (in, out), compute dtype (bf16)
            b = wb_refs[2 * l + 1][...]      # (1, out), f32
            # MXU matmul in bf16 operands, f32 accumulation; bias/ReLU in f32 on the VPU.
            z = jnp.dot(z.astype(w.dtype), w,
                        preferred_element_type=jnp.float32) + b
            if l < num_layers - 1:
                z = jnp.maximum(z, 0.0)
        out_ref[...] = z.astype(out_ref.dtype)

    return kernel


def text2color_forward(x, params, *, tile_b=256, use_bf16=True):
    """x: (B, input_dim) float. params: list of (W, b) with W (in, out), b (1, out).

    Matches PyTorch: z = input.float(); z = z @ W.T + b per layer, ReLU between layers.
    (Weights here are stored already transposed, i.e. (in, out).)
    """
    x = jnp.asarray(x, jnp.float32)  # input.float()
    B, in_dim = x.shape
    out_dim = params[-1][0].shape[1]
    num_layers = len(params)

    # ---- Lane-dense output: pad the final layer out to a multiple of 128 lanes. ----
    out_pad = max(128, _round_up(out_dim, 128))
    W_last, b_last = params[-1]
    if out_pad != out_dim:
        W_last = jnp.pad(W_last, ((0, 0), (0, out_pad - out_dim)))
        b_last = jnp.pad(b_last, ((0, 0), (0, out_pad - out_dim)))
    params = list(params[:-1]) + [(W_last, b_last)]

    # ---- Batch tiling: big tiles (MXU rows), multiple of 16 sublanes for bf16 packing. ----
    tile_b = max(16, min(_round_up(tile_b, 16), _round_up(B, 16)))
    grid_b = pl.cdiv(B, tile_b)
    B_pad = grid_b * tile_b
    if B_pad != B:
        x = jnp.pad(x, ((0, B_pad - B), (0, 0)))

    # ---- Compute dtypes: bf16 operands for the MXU, f32 biases / accumulation. ----
    compute_dtype = jnp.bfloat16 if use_bf16 else jnp.float32
    flat = []
    for W, b in params:
        flat.append(W.astype(compute_dtype))
        flat.append(b.astype(jnp.float32))
    x_in = x.astype(compute_dtype)

    # ---- Block specs: batch-tiled activations/output, fully-resident weights/biases. ----
    def resident(arr):
        # Whole-array block with a constant index_map -> stays in VMEM across grid steps.
        return pl.BlockSpec(arr.shape, lambda i: (0,) * arr.ndim)

    in_specs = [pl.BlockSpec((tile_b, in_dim), lambda i: (i, 0))]
    in_specs += [resident(a) for a in flat]
    out_specs = pl.BlockSpec((tile_b, out_pad), lambda i: (i, 0))

    # ---- Advisory cost estimate for the XLA scheduler. ----
    flops = sum(2 * B_pad * W.shape[0] * W.shape[1] for W, _ in params)
    bytes_accessed = (x_in.size * x_in.dtype.itemsize
                      + sum(a.size * a.dtype.itemsize for a in flat)
                      + B_pad * out_pad * 4)
    cost = pl.CostEstimate(flops=flops, transcendentals=0,
                           bytes_accessed=bytes_accessed)

    out = pl.pallas_call(
        make_mlp_kernel(num_layers),
        out_shape=jax.ShapeDtypeStruct((B_pad, out_pad), jnp.float32),
        grid_spec=pltpu.PrefetchScalarGridSpec(
            num_scalar_prefetch=0,
            grid=(grid_b,),
            in_specs=in_specs,
            out_specs=out_specs,
        ),
        compiler_params=pltpu.CompilerParams(
            dimension_semantics=("parallel",)),
        cost_estimate=cost,
    )(x_in, *flat)

    return out[:B, :out_dim]


def init_params(key, input_dim, width, out_dim, mlp_depth):
    """Deterministic init mimicking nn.Linear's U(-1/sqrt(fan_in), 1/sqrt(fan_in))."""
    dims = [(input_dim, width)] + [(width, width)] * mlp_depth + [(width, out_dim)]
    params = []
    for (fan_in, fan_out) in dims:
        key, kw, kb = jax.random.split(key, 3)
        bound = 1.0 / (fan_in ** 0.5)
        W = jax.random.uniform(kw, (fan_in, fan_out), jnp.float32, -bound, bound)
        b = jax.random.uniform(kb, (1, fan_out), jnp.float32, -bound, bound)
        params.append((W, b))
    return params


def reference_forward(x, params, compute_dtype=jnp.float32):
    """Pure-JAX reference. compute_dtype=bf16 mimics the kernel's MXU operand dtype."""
    z = jnp.asarray(x, jnp.float32)
    n = len(params)
    for idx, (W, b) in enumerate(params):
        z = jnp.dot(z.astype(compute_dtype), W.astype(compute_dtype),
                    preferred_element_type=jnp.float32) + b
        if idx < n - 1:
            z = jnp.maximum(z, 0.0)
    return z


if __name__ == "__main__":
    # Small shapes consistent with the module (input_dim=width=out_dim, mlp_depth=2),
    # sized so the grid has 2 steps (both v7x TensorCores busy) with 256-row MXU tiles.
    B, INPUT_DIM, WIDTH, OUT_DIM, MLP_DEPTH = 512, 256, 256, 256, 2

    key = jax.random.PRNGKey(0)
    key, kx = jax.random.split(key)
    x = jax.random.normal(kx, (B, INPUT_DIM), jnp.float32)

    params = init_params(key, INPUT_DIM, WIDTH, OUT_DIM, MLP_DEPTH)

    out = jax.block_until_ready(text2color_forward(x, params, tile_b=256))
    assert out.shape == (B, OUT_DIM)

    # Tight check vs a reference using the same bf16-operand / f32-accumulate recipe.
    ref_bf16 = reference_forward(x, params, compute_dtype=jnp.bfloat16)
    assert jnp.allclose(out, ref_bf16, atol=1e-2, rtol=1e-2)

    # Loose check vs the full-f32 PyTorch-equivalent reference (bf16 operand rounding).
    ref_f32 = reference_forward(x, params, compute_dtype=jnp.float32)
    assert jnp.allclose(out, ref_f32, atol=6e-2, rtol=6e-2)

    print("KERNEL_OK")
</pallas_src>

<mosaic_0001>
module attributes {stable_mosaic.version = 11 : i64} {
  func.func @kernel(%arg0: i32, %arg1: memref<256x256xbf16, #tpu.memory_space<vmem>>, %arg2: memref<256x256xbf16, #tpu.memory_space<vmem>>, %arg3: memref<1x256xf32, #tpu.memory_space<vmem>>, %arg4: memref<256x256xbf16, #tpu.memory_space<vmem>>, %arg5: memref<1x256xf32, #tpu.memory_space<vmem>>, %arg6: memref<256x256xbf16, #tpu.memory_space<vmem>>, %arg7: memref<1x256xf32, #tpu.memory_space<vmem>>, %arg8: memref<256x256xbf16, #tpu.memory_space<vmem>>, %arg9: memref<1x256xf32, #tpu.memory_space<vmem>>, %arg10: memref<256x256xf32, #tpu.memory_space<vmem>>) attributes {dimension_semantics = [#tpu.dimension_semantics<parallel>], iteration_bounds = array<i64: 2>, scalar_prefetch = 0 : i64, scratch_operands = 0 : i64, tpu.core_type = #tpu.core_type<tc>, window_params = [{transform_indices = @transform_0, window_bounds = array<i64: 256, 256>}, {pipeline_mode = #tpu.pipeline_mode<synchronous>, transform_indices = @transform_1, window_bounds = array<i64: 256, 256>}, {pipeline_mode = #tpu.pipeline_mode<synchronous>, transform_indices = @transform_2, window_bounds = array<i64: 1, 256>}, {pipeline_mode = #tpu.pipeline_mode<synchronous>, transform_indices = @transform_3, window_bounds = array<i64: 256, 256>}, {pipeline_mode = #tpu.pipeline_mode<synchronous>, transform_indices = @transform_4, window_bounds = array<i64: 1, 256>}, {pipeline_mode = #tpu.pipeline_mode<synchronous>, transform_indices = @transform_5, window_bounds = array<i64: 256, 256>}, {pipeline_mode = #tpu.pipeline_mode<synchronous>, transform_indices = @transform_6, window_bounds = array<i64: 1, 256>}, {pipeline_mode = #tpu.pipeline_mode<synchronous>, transform_indices = @transform_7, window_bounds = array<i64: 256, 256>}, {pipeline_mode = #tpu.pipeline_mode<synchronous>, transform_indices = @transform_8, window_bounds = array<i64: 1, 256>}, {transform_indices = @transform_9, window_bounds = array<i64: 256, 256>}]} {
    %c0 = arith.constant 0 : index
    %c0_0 = arith.constant 0 : index
    %0 = vector.load %arg1[%c0, %c0_0] : memref<256x256xbf16, #tpu.memory_space<vmem>>, vector<256x256xbf16>
    %c0_1 = arith.constant 0 : index
    %c0_2 = arith.constant 0 : index
    %1 = vector.load %arg2[%c0_1, %c0_2] : memref<256x256xbf16, #tpu.memory_space<vmem>>, vector<256x256xbf16>
    %c0_3 = arith.constant 0 : index
    %c0_4 = arith.constant 0 : index
    %2 = vector.load %arg3[%c0_3, %c0_4] : memref<1x256xf32, #tpu.memory_space<vmem>>, vector<1x256xf32>
    %cst = arith.constant dense<0.000000e+00> : vector<256x256xf32>
    %3 = tpu.matmul %0, %1, %cst {dimension_numbers = #tpu.dot_dimension_numbers<[1], [0], [0], [1], [0, 0, 1, 1], [], []>} : vector<256x256xbf16>, vector<256x256xbf16>, vector<256x256xf32> -> vector<256x256xf32>
    %4 = vector.broadcast %2 : vector<1x256xf32> to vector<256x256xf32>
    %5 = arith.addf %3, %4 : vector<256x256xf32>
    %cst_5 = arith.constant 0.000000e+00 : f32
    %6 = vector.broadcast %cst_5 : f32 to vector<256x256xf32>
    %7 = arith.maximumf %5, %6 : vector<256x256xf32>
    %c0_6 = arith.constant 0 : index
    %c0_7 = arith.constant 0 : index
    %8 = vector.load %arg4[%c0_6, %c0_7] : memref<256x256xbf16, #tpu.memory_space<vmem>>, vector<256x256xbf16>
    %c0_8 = arith.constant 0 : index
    %c0_9 = arith.constant 0 : index
    %9 = vector.load %arg5[%c0_8, %c0_9] : memref<1x256xf32, #tpu.memory_space<vmem>>, vector<1x256xf32>
    %10 = arith.truncf %7 : vector<256x256xf32> to vector<256x256xbf16>
    %cst_10 = arith.constant dense<0.000000e+00> : vector<256x256xf32>
    %11 = tpu.matmul %10, %8, %cst_10 {dimension_numbers = #tpu.dot_dimension_numbers<[1], [0], [0], [1], [0, 0, 1, 1], [], []>} : vector<256x256xbf16>, vector<256x256xbf16>, vector<256x256xf32> -> vector<256x256xf32>
    %12 = vector.broadcast %9 : vector<1x256xf32> to vector<256x256xf32>
    %13 = arith.addf %11, %12 : vector<256x256xf32>
    %cst_11 = arith.constant 0.000000e+00 : f32
    %14 = vector.broadcast %cst_11 : f32 to vector<256x256xf32>
    %15 = arith.maximumf %13, %14 : vector<256x256xf32>
    %c0_12 = arith.constant 0 : index
    %c0_13 = arith.constant 0 : index
    %16 = vector.load %arg6[%c0_12, %c0_13] : memref<256x256xbf16, #tpu.memory_space<vmem>>, vector<256x256xbf16>
    %c0_14 = arith.constant 0 : index
    %c0_15 = arith.constant 0 : index
    %17 = vector.load %arg7[%c0_14, %c0_15] : memref<1x256xf32, #tpu.memory_space<vmem>>, vector<1x256xf32>
    %18 = arith.truncf %15 : vector<256x256xf32> to vector<256x256xbf16>
    %cst_16 = arith.constant dense<0.000000e+00> : vector<256x256xf32>
    %19 = tpu.matmul %18, %16, %cst_16 {dimension_numbers = #tpu.dot_dimension_numbers<[1], [0], [0], [1], [0, 0, 1, 1], [], []>} : vector<256x256xbf16>, vector<256x256xbf16>, vector<256x256xf32> -> vector<256x256xf32>
    %20 = vector.broadcast %17 : vector<1x256xf32> to vector<256x256xf32>
    %21 = arith.addf %19, %20 : vector<256x256xf32>
    %cst_17 = arith.constant 0.000000e+00 : f32
    %22 = vector.broadcast %cst_17 : f32 to vector<256x256xf32>
    %23 = arith.maximumf %21, %22 : vector<256x256xf32>
    %c0_18 = arith.constant 0 : index
    %c0_19 = arith.constant 0 : index
    %24 = vector.load %arg8[%c0_18, %c0_19] : memref<256x256xbf16, #tpu.memory_space<vmem>>, vector<256x256xbf16>
    %c0_20 = arith.constant 0 : index
    %c0_21 = arith.constant 0 : index
    %25 = vector.load %arg9[%c0_20, %c0_21] : memref<1x256xf32, #tpu.memory_space<vmem>>, vector<1x256xf32>
    %26 = arith.truncf %23 : vector<256x256xf32> to vector<256x256xbf16>
    %cst_22 = arith.constant dense<0.000000e+00> : vector<256x256xf32>
    %27 = tpu.matmul %26, %24, %cst_22 {dimension_numbers = #tpu.dot_dimension_numbers<[1], [0], [0], [1], [0, 0, 1, 1], [], []>} : vector<256x256xbf16>, vector<256x256xbf16>, vector<256x256xf32> -> vector<256x256xf32>
    %28 = vector.broadcast %25 : vector<1x256xf32> to vector<256x256xf32>
    %29 = arith.addf %27, %28 : vector<256x256xf32>
    %c0_23 = arith.constant 0 : index
    %c0_24 = arith.constant 0 : index
    %30 = vector.load %arg10[%c0_23, %c0_24] : memref<256x256xf32, #tpu.memory_space<vmem>>, vector<256x256xf32>
    tpu.vector_store %arg10[%c0_23, %c0_24], %29 {strides = array<i32>} : memref<256x256xf32, #tpu.memory_space<vmem>>, vector<256x256xf32>,
    return
  }
  func.func @transform_0(%arg0: i32) -> (i32, i32) {
    %c0_i32 = arith.constant 0 : i32
    %c0_i32_0 = arith.constant 0 : i32
    return %arg0, %c0_i32 : i32, i32
  }
  func.func @transform_1(%arg0: i32) -> (i32, i32) {
    %c0_i32 = arith.constant 0 : i32
    %c0_i32_0 = arith.constant 0 : i32
    %c0_i32_1 = arith.constant 0 : i32
    return %c0_i32, %c0_i32_0 : i32, i32
  }
  func.func @transform_2(%arg0: i32) -> (i32, i32) {
    %c0_i32 = arith.constant 0 : i32
    %c0_i32_0 = arith.constant 0 : i32
    %c0_i32_1 = arith.constant 0 : i32
    return %c0_i32, %c0_i32_0 : i32, i32
  }
  func.func @transform_3(%arg0: i32) -> (i32, i32) {
    %c0_i32 = arith.constant 0 : i32
    %c0_i32_0 = arith.constant 0 : i32
    %c0_i32_1 = arith.constant 0 : i32
    return %c0_i32, %c0_i32_0 : i32, i32
  }
  func.func @transform_4(%arg0: i32) -> (i32, i32) {
    %c0_i32 = arith.constant 0 : i32
    %c0_i32_0 = arith.constant 0 : i32
    %c0_i32_1 = arith.constant 0 : i32
    return %c0_i32, %c0_i32_0 : i32, i32
  }
  func.func @transform_5(%arg0: i32) -> (i32, i32) {
    %c0_i32 = arith.constant 0 : i32
    %c0_i32_0 = arith.constant 0 : i32
    %c0_i32_1 = arith.constant 0 : i32
    return %c0_i32, %c0_i32_0 : i32, i32
  }
  func.func @transform_6(%arg0: i32) -> (i32, i32) {
    %c0_i32 = arith.constant 0 : i32
    %c0_i32_0 = arith.constant 0 : i32
    %c0_i32_1 = arith.constant 0 : i32
    return %c0_i32, %c0_i32_0 : i32, i32
  }
  func.func @transform_7(%arg0: i32) -> (i32, i32) {
    %c0_i32 = arith.constant 0 : i32
    %c0_i32_0 = arith.constant 0 : i32
    %c0_i32_1 = arith.constant 0 : i32
    return %c0_i32, %c0_i32_0 : i32, i32
  }
  func.func @transform_8(%arg0: i32) -> (i32, i32) {
    %c0_i32 = arith.constant 0 : i32
    %c0_i32_0 = arith.constant 0 : i32
    %c0_i32_1 = arith.constant 0 : i32
    return %c0_i32, %c0_i32_0 : i32, i32
  }
  func.func @transform_9(%arg0: i32) -> (i32, i32) {
    %c0_i32 = arith.constant 0 : i32
    %c0_i32_0 = arith.constant 0 : i32
    return %arg0, %c0_i32 : i32, i32
  }
}

</mosaic_0001>

<bundles_post_ra>
// kernel: tpu_custom_call.1
= control target key start
LH: loop header
LB: loop body
LE: loop exit
PB: predicated region body
PF: predicated region fallthrough
CT: control target
= control target key end

     0   :  { %s4157_s0 = inlined_call_operand.hbm [shape: bf16[512,256], index: 0, kind: input, shape index: {}]   ;;  %s4158_s1 = inlined_call_operand.hbm [shape: bf16[256,256], index: 1, kind: input, shape index: {}]   ;;  %s4159_s2 = inlined_call_operand.vmem [shape: f32[1,256], index: 2, kind: input, shape index: {}]   ;;  %s4160_s3 = inlined_call_operand.hbm [shape: bf16[256,256], index: 3, kind: input, shape index: {}]   ;;  %s4161_s4 = inlined_call_operand.vmem [shape: f32[1,256], index: 4, kind: input, shape index: {}]   ;;  %s4162_s5 = inlined_call_operand.hbm [shape: bf16[256,256], index: 5, kind: input, shape index: {}]   ;;  %s4163_s6 = inlined_call_operand.vmem [shape: f32[1,256], index: 6, kind: input, shape index: {}]   ;;  %s4164_s7 = inlined_call_operand.hbm [shape: bf16[256,256], index: 7, kind: input, shape index: {}]   ;;  %s4165_s8 = inlined_call_operand.vmem [shape: f32[1,256], index: 8, kind: input, shape index: {}]   ;;  %s4166_s9 = inlined_call_operand.hbm [shape: f32[512,256], index: 9, kind: output, shape index: {}]  }
   0x1   :  { %4173 = sst [smem:[#allocation18_spill]] %s4166_s9 }
   0x2   :  { %14 = vsyncpa [#allocation3], 0 }
   0x3   :  { %16 = vsyncpa [#allocation3 + $0x1], 0 }
   0x4   :  { %17 = vsyncpa [#allocation6], 0 }
   0x5   :  { %18 = vsyncpa [#allocation9], 0 }
   0x6   :  { %19 = vsyncpa [#allocation4], 0 }
   0x7   :  { %21 = vsyncpa [#allocation4 + $0x1], 0  ;;  %s3467_s30 = smov 0   ;;  %s3469_s10 = smov 0  }
   0x8   :  { %s3471_s11 = smov 0   ;;  %s3473_s12 = smov 0  }
   0x9 LB: > { %4174 = sst [smem:[#allocation16_spill]] %s3393_s30  ;;  %s3488_s13 = sadd.s32 4294967295, %s3405_s12   ;;  %s3405_s12 = sphi %s3473_s12, %s4198_s12   ;;  %s3401_s11 = sphi %s3471_s11, %s4197_s11   ;;  %s3397_s10 = sphi %s3469_s10, %s4196_s10   ;;  %s3393_s30 = sphi %s3467_s30, %s4195_s30  }
   0xa   : > { %s2670_s14 = sadd.s32 4294967294, %s3405_s12   ;;  %p47_p0 = scmp.ne.s32.totalorder %s3397_s10, %s3393_s30 }
   0xb   : > { %p4167_p1 = scmp.eq.s32.totalorder %s3488_s13, 0  ;;  %p245_p3 = scmp.eq.s32.totalorder %s2670_s14, 1 }
   0xc   : > { %p2671_p5 = scmp.ge.s32.totalorder %s3405_s12, 1  ;;  %p252_p7 = scmp.lt.s32.totalorder %s3405_s12, 3 }
   0xd   : > { %p3497_p4 = por %p4167_p1, %p47_p0  ;;  %p3502_p6 = por %p245_p3, %p47_p0 }
   0xe   : > { %p3507_p8 = pnand %p2671_p5, %p252_p7  ;;  %s3407_s18 = smov [#allocation5]  }
   0xf   : > { %s4175_s15 = scalar_select %p3497_p4, 1, 0 }
  0x10   : > { %s4176_s16 = scalar_select %p3502_p6, 1, 0 }
  0x11   : > { %s4178_s17 = scalar_select %p3507_p8, 1, 0 }
  0x12   : > { %4177 = sst [smem:[#allocation17_spill]] %s4176_s16  ;;  %s264_s19 = sshll.u32 %s3407_s18, 4  ;;  %s3511_s19 = int_to_ptr.vmem [resolvable:$true] %s264_s19 }
  0x13   : > { %p2878_p9 = pneg %p3507_p8  ;;  %s3408_s21 = smov [#allocation8]  }
  0x14   : > { %s296_s22 = sshll.u32 %s3408_s21, 4  ;;  %s3409_s23 = smov [#allocation7]   ;;  %s3522_s22 = int_to_ptr.vmem [resolvable:$true] %s296_s22 }
  0x15   : > { %p3518_p11 = pnand %p2878_p9, %p4167_p1  ;;  %s3524_s24 = sshll.u32 %s3409_s23, 4  ;;  %s281_s24 = int_to_ptr.vmem [resolvable:$true] %s3524_s24 }
  0x16   : > { %s3189_s27 = scalar_lea.hbm %s4158_s1, 4096 }
  0x17   : > { %p3190_p12 = scmp.ne.s32.totalorder %s4158_s1, %s3189_s27  ;;  %p3534_p13 = pneg %p3518_p11 }
  0x18   : > { %p3196_p5 = scmp.lt.u32.totalorder %s3189_s27, %s4158_s1 }
  0x19   : > { %p3192_p0 = pnand %p3534_p13, %p3190_p12 }
  0x1b   : > { %p3193_p3 = pneg %p3192_p0 }
  0x1d   : > { %p3198_p7 = pnand %p3196_p5, %p3193_p3 }
  0x1f   : > { %3201 = shalt.err (!%p3198_p7)
}
  0x20   : > { %s3202_s23 = scalar_lea.vmem %s3511_s19, 4096  ;;  %p3210_p2 = scmp.lt.s32.totalorder %s3511_s19, %s3511_s19 }
  0x21   : > { %p3203_p9 = scmp.ne.s32.totalorder %s3511_s19, %s3202_s23  ;;  %p3211_p6 = scmp.lt.s32.totalorder %s3202_s23, %s3202_s23 }
  0x23   : > { %p3205_p10 = pnand %p3203_p9, %p3534_p13  ;;  %p3212_p12 = por %p3211_p6, %p3210_p2 }
  0x25   : > { %p3206_p1 = pneg %p3205_p10 }
  0x27   : > { %p3213_p0 = pnand %p3212_p12, %p3206_p1 }
  0x29   : > { %3216 = shalt.err (!%p3213_p0)
}
  0x2a   : > { %s3410_s25 = smov 128   ;;  %s3411_s26 = smov 8  }
  0x2b   : > { %2881 = dma.hbm_to_vmem [thread:$0]  (!%p3518_p11), %s4158_s1, 4096, %s3511_s19, [#allocation6], %s3410_s25, %s3410_s25, %s3411_s26  }
  0x2c   : > { %s3217_s21 = scalar_lea.hbm %s4162_s5, 4096 }
  0x2d   : > { %p3218_p1 = scmp.ne.s32.totalorder %s4162_s5, %s3217_s21  ;;  %p3224_p10 = scmp.lt.u32.totalorder %s3217_s21, %s4162_s5 }
  0x2f   : > { %p3220_p2 = pnand %p3218_p1, %p3534_p13 }
  0x31   : > { %p3221_p6 = pneg %p3220_p2 }
  0x33   : > { %p3226_p3 = pnand %p3224_p10, %p3221_p6 }
  0x35   : > { %3229 = shalt.err (!%p3226_p3)
}
  0x36   : > { %s3230_s19 = scalar_lea.vmem %s3522_s22, 4096  ;;  %p3238_p12 = scmp.lt.s32.totalorder %s3522_s22, %s3522_s22 }
  0x37   : > { %p3231_p5 = scmp.ne.s32.totalorder %s3522_s22, %s3230_s19  ;;  %p3239_p0 = scmp.lt.s32.totalorder %s3230_s19, %s3230_s19 }
  0x39   : > { %p3233_p7 = pnand %p3231_p5, %p3534_p13  ;;  %p3240_p1 = por %p3239_p0, %p3238_p12 }
  0x3b   : > { %p3234_p9 = pneg %p3233_p7 }
  0x3d   : > { %p3241_p2 = pnand %p3240_p1, %p3234_p9 }
  0x3f   : > { %3244 = shalt.err (!%p3241_p2)
}
  0x40   : > { %2887 = dma.hbm_to_vmem [thread:$0]  (!%p3518_p11), %s4162_s5, 4096, %s3522_s22, [#allocation9], %s3410_s25, %s3410_s25, %s3411_s26  }
  0x41   : > { %s3245_s28 = scalar_lea.hbm %s4160_s3, 4096 }
  0x42   : > { %p3246_p6 = scmp.ne.s32.totalorder %s4160_s3, %s3245_s28  ;;  %p3252_p5 = scmp.lt.u32.totalorder %s3245_s28, %s4160_s3 }
  0x44   : > { %p3248_p10 = pnand %p3246_p6, %p3534_p13 }
  0x46   : > { %p3249_p3 = pneg %p3248_p10 }
  0x48   : > { %p3254_p7 = pnand %p3252_p5, %p3249_p3 }
  0x4a   : > { %3257 = shalt.err (!%p3254_p7)
}
  0x4b   : > { %s3258_s19 = scalar_lea.vmem %s281_s24, 4096  ;;  %p3266_p1 = scmp.lt.s32.totalorder %s281_s24, %s281_s24 }
  0x4c   : > { %p3259_p9 = scmp.ne.s32.totalorder %s281_s24, %s3258_s19  ;;  %p3267_p2 = scmp.lt.s32.totalorder %s3258_s19, %s3258_s19 }
  0x4e   : > { %p3261_p12 = pnand %p3259_p9, %p3534_p13  ;;  %p3268_p4 = por %p3267_p2, %p3266_p1 }
  0x50   : > { %p3262_p0 = pneg %p3261_p12 }
  0x52   : > { %p3269_p8 = pnand %p3268_p4, %p3262_p0 }
  0x54   : > { %3272 = shalt.err (!%p3269_p8)
}
  0x55   : > { %2884 = dma.hbm_to_vmem [thread:$0]  (!%p3518_p11), %s4160_s3, 4096, %s281_s24, [#allocation6], %s3410_s25, %s3410_s25, %s3411_s26  }
  0x56   : > { %s3412_s30 = smov [#allocation10]   ;;  %s3273_s29 = scalar_lea.hbm %s4164_s7, 4096 }
  0x57   : > { %s312_s16 = sshll.u32 %s3412_s30, 4  ;;  %p3274_p4 = scmp.ne.s32.totalorder %s4164_s7, %s3273_s29  ;;  %s313_s16 = int_to_ptr.vmem [resolvable:$true] %s312_s16 }
  0x58   : > { %p3280_p10 = scmp.lt.u32.totalorder %s3273_s29, %s4164_s7 }
  0x59   : > { %p3276_p8 = pnand %p3274_p4, %p3534_p13 }
  0x5b   : > { %p3277_p6 = pneg %p3276_p8 }
  0x5d   : > { %p3282_p3 = pnand %p3280_p10, %p3277_p6 }
  0x5f   : > { %3285 = shalt.err (!%p3282_p3)
}
  0x60   : > { %s3286_s24 = scalar_lea.vmem %s313_s16, 4096  ;;  %p3294_p12 = scmp.lt.s32.totalorder %s313_s16, %s313_s16 }
  0x61   : > { %p3287_p5 = scmp.ne.s32.totalorder %s313_s16, %s3286_s24  ;;  %p3295_p0 = scmp.lt.s32.totalorder %s3286_s24, %s3286_s24 }
  0x63   : > { %p3289_p7 = pnand %p3287_p5, %p3534_p13  ;;  %p3296_p1 = por %p3295_p0, %p3294_p12 }
  0x65   : > { %p3290_p9 = pneg %p3289_p7 }
  0x67   : > { %p3297_p2 = pnand %p3296_p1, %p3290_p9 }
  0x69   : > { %3300 = shalt.err (!%p3297_p2)
}
  0x6a   : > { %2890 = dma.hbm_to_vmem [thread:$0]  (!%p3518_p11), %s4164_s7, 4096, %s313_s16, [#allocation9], %s3410_s25, %s3410_s25, %s3411_s26  }
  0x6b   : > { %s3628_s14 = sadd.s32 1, %s3405_s12   ;;  %s34_s20 = sadd.s32 1, %s3401_s11 }
  0x6c   : > { %s31_s30 = ssub.s32 %s3405_s12, %s3628_s14  ;;  %p41_p13 = scmp.ne.s32.totalorder %s3401_s11, %s3397_s10 }
  0x6d   : > { %p32_p4 = scmp.eq.s32.totalorder %s31_s30, 0  ;;  %p42_p8 = scmp.eq.s32.totalorder %s3405_s12, 0 }
  0x6e   : > { %p4181_p6 = scmp.eq.s32.totalorder %s3488_s13, 1  ;;  %p2903_p3 = scmp.lt.s32.totalorder %s3405_s12, 2 }
  0x6f   : > { %s3644_s28 = scalar_select %p32_p4, %s3401_s11, %s34_s20  }
  0x70   : > { %p3638_p10 = por %p4181_p6, %p41_p13  ;;  %p43_p5 = por %p42_p8, %p41_p13 }
  0x71   : > { %s329_s29 = sand.u32 1, %s3401_s11   ;;  %s2855_s16 = sshll.u32 %s3405_s12, 12 }
  0x72   : > { %s2677_s18 = sshll.u32 %s329_s29, 8  ;;  %s3651_s19 = scalar_lea.hbm %s4157_s0, %s2855_s16 }
  0x73   : > { %s333_s24 = scalar_lea.vmem [#allocation2], %s2677_s18  ;;  %p3655_p11 = pnand %p2903_p3, %p43_p5 }
  0x74   : > { %s341_s22 = sshll.u32 %s333_s24, 4  ;;  %s3659_s20 = scalar_lea.sflag [#allocation3], %s329_s29  ;;  %s3653_s22 = int_to_ptr.vmem [resolvable:$true] %s341_s22 }
  0x75   : > { %s3301_s30 = scalar_lea.hbm %s3651_s19, 4096  ;;  %p3303_p9 = pneg %p3655_p11 }
  0x76   : > { %p3302_p7 = scmp.ne.s32.totalorder %s3651_s19, %s3301_s30  ;;  %s3306_s21 = scalar_lea.hbm %s4157_s0, 8192 }
  0x77   : > { %p3307_p1 = scmp.lt.u32.totalorder %s3651_s19, %s4157_s0  ;;  %p3308_p2 = scmp.lt.u32.totalorder %s3306_s21, %s3301_s30 }
  0x78   : > { %p3304_p12 = pnand %p3303_p9, %p3302_p7  ;;  %p3310_p4 = scmp.lt.u32.totalorder %s3301_s30, %s3651_s19 }
  0x79   : > { %p3309_p13 = por %p3308_p2, %p3307_p1 }
  0x7a   : > { %p3305_p0 = pneg %p3304_p12 }
  0x7b   : > { %p3311_p8 = por %p3310_p4, %p3309_p13 }
  0x7d   : > { %p3312_p6 = pnand %p3311_p8, %p3305_p0 }
  0x7f   : > { %3315 = shalt.err (!%p3312_p6)
}
  0x80   : > { %s3316_s29 = scalar_lea.vmem %s3653_s22, 4096  ;;  %s3413_s18 = smov [#allocation2]  }
  0x81   : > { %p3317_p3 = scmp.ne.s32.totalorder %s3653_s22, %s3316_s29  ;;  %s3321_s16 = sshll.u32 %s3413_s18, 4  ;;  %s3322_s16 = int_to_ptr.vmem [resolvable:$false] %s3321_s16 }
  0x82   : > { %s3323_s23 = scalar_lea.vmem %s3322_s16, 8192  ;;  %p3324_p12 = scmp.lt.s32.totalorder %s3653_s22, %s3322_s16 }
  0x83   : > { %p3319_p5 = pnand %p3317_p3, %p3303_p9  ;;  %p3325_p1 = scmp.lt.s32.totalorder %s3323_s23, %s3316_s29 }
  0x85   : > { %p3320_p7 = pneg %p3319_p5  ;;  %p3326_p2 = por %p3325_p1, %p3324_p12 }
  0x87   : > { %p3327_p13 = pnand %p3326_p2, %p3320_p7 }
  0x89   : > { %3330 = shalt.err (!%p3327_p13)
}
  0x8a   : > { %2894 = dma.hbm_to_vmem [thread:$0]  (!%p3655_p11), %s3651_s19, 4096, %s3653_s22, %s3659_s20, %s3410_s25, %s3410_s25, %s3411_s26  }
  0x8b   : > { %p4184_p9 = scmp.ne.s32.totalorder %s4178_s17, 0 }
  0x8c   : > { %s3693_s30 = sand.u32 (!%p4184_p9), 1, %s3397_s10   ;;  %p4185_p0 = scmp.ne.s32.totalorder (!%p4184_p9), %s4175_s15, 0 }
  0x8d   : > { %353 = sbr.rel (%p4184_p9) target bundleno = 1239 (0x4d7), region = 56  ;;  %s2682_s21 = sshll.u32 (!%p4184_p9), %s3693_s30, 8 }
  0x8e   : > { %s356_s24 = scalar_lea.sflag (!%p4184_p9), [#allocation3], %s3693_s30  ;;  %s3697_s29 = scalar_lea.vmem (!%p4184_p9), [#allocation2], %s2682_s21 }
  0x94   : > { %3376 = dma.done.wait (%p4185_p0), %s356_s24, 4096  }
  0x95   : > { %3378 = vsyncadd (%p4185_p0), %s356_s24, 4294963200  ;;  %p4186_p11 = scmp.eq.s32.totalorder %s3488_s13, 0 }
  0x97   : > { %3380 = dma.done.wait (%p4186_p11), [#allocation6], 8192   ;;  %p4187_p4 = pmov %p4186_p11 }
  0x99   : > { %3382 = vsyncadd (%p4187_p4), [#allocation6], 4294959104  ;;  %p4188_p8 = pmov %p4187_p4 }
  0x9a   : > { %p4189_p6 = pmov %p4187_p4 }
  0x9b   : > { %3384 = dma.done.wait (%p4188_p8), [#allocation9], 8192  }
  0x9c   : > { %3386 = vsyncadd (%p4189_p6), [#allocation9], 4294959104  ;;  %v2949_v0 = vld [vmem:[#allocation5 + $0x4] ss:$8 sps:$4 sm:$0xff]   ;;  %v2951_v1 = vld [vmem:[#allocation5] ss:$8 sps:$4 sm:$0xff]  }
  0x9d   : > { %808 = vmatprep.subr.bf16.mxu0 %v2949_v0  ;;  %v2952_v2 = vld [vmem:[#allocation5 + $0x14] ss:$8 sps:$4 sm:$0xff]   ;;  %v2954_v3 = vld [vmem:[#allocation5 + $0x10] ss:$8 sps:$4 sm:$0xff]   ;;  %v2955_v4 = vld [vmem:[#allocation5 + $0x24] ss:$8 sps:$4 sm:$0xff]  }
  0x9e   : > { %809 = vmatpush1.bf16.msra.mxu0 %v2951_v1  ;;  %v2957_v5 = vld [vmem:[#allocation5 + $0x20] ss:$8 sps:$4 sm:$0xff]   ;;  %v2958_v6 = vld [vmem:[#allocation5 + $0x34] ss:$8 sps:$4 sm:$0xff]   ;;  %v2960_v7 = vld [vmem:[#allocation5 + $0x30] ss:$8 sps:$4 sm:$0xff]  }
  0x9f   : > { %810 = vmatprep.subr.bf16.mxu0 %v2952_v2  ;;  %v2961_v8 = vld [vmem:[#allocation5 + $0x44] ss:$8 sps:$4 sm:$0xff]   ;;  %v2963_v9 = vld [vmem:[#allocation5 + $0x40] ss:$8 sps:$4 sm:$0xff]   ;;  %v2964_v10 = vld [vmem:[#allocation5 + $0x54] ss:$8 sps:$4 sm:$0xff]  }
  0xa0   : > { %v2966_v11 = vld [vmem:[#allocation5 + $0x50] ss:$8 sps:$4 sm:$0xff]   ;;  %v2967_v12 = vld [vmem:[#allocation5 + $0x64] ss:$8 sps:$4 sm:$0xff]   ;;  %v2969_v14 = vld [vmem:[#allocation5 + $0x60] ss:$8 sps:$4 sm:$0xff]  }
  0xa1   : > { %v2999_v13 = vld [vmem:[%s3697_s29 + $0x4] ss:$8 sps:$4 sm:$0xff]   ;;  %v2970_v15 = vld [vmem:[#allocation5 + $0x74] ss:$8 sps:$4 sm:$0xff]   ;;  %v2972_v16 = vld [vmem:[#allocation5 + $0x70] ss:$8 sps:$4 sm:$0xff]  }
  0xa2   : > { %811 = vmatpush1.bf16.msra.mxu0 %v2954_v3  ;;  %840 = vmatprep.mubr.bf16.mxu0 %v2999_v13  ;;  %v2973_v17 = vld [vmem:[#allocation5 + $0x84] ss:$8 sps:$4 sm:$0xff]   ;;  %v2975_v18 = vld [vmem:[#allocation5 + $0x80] ss:$8 sps:$4 sm:$0xff]   ;;  %v2976_v19 = vld [vmem:[#allocation5 + $0x94] ss:$8 sps:$4 sm:$0xff]  }
  0xa3   : > { %812 = vmatprep.subr.bf16.mxu0 %v2955_v4  ;;  %v2978_v20 = vld [vmem:[#allocation5 + $0x90] ss:$8 sps:$4 sm:$0xff]   ;;  %v2979_v21 = vld [vmem:[#allocation5 + $0xa4] ss:$8 sps:$4 sm:$0xff]   ;;  %v2981_v22 = vld [vmem:[#allocation5 + $0xa0] ss:$8 sps:$4 sm:$0xff]  }
  0xa4   : > { %v2982_v23 = vld [vmem:[#allocation5 + $0xb4] ss:$8 sps:$4 sm:$0xff]   ;;  %v2984_v24 = vld [vmem:[#allocation5 + $0xb0] ss:$8 sps:$4 sm:$0xff]   ;;  %v2985_v25 = vld [vmem:[#allocation5 + $0xc4] ss:$8 sps:$4 sm:$0xff]  }
  0xa5   : > { %v2987_v26 = vld [vmem:[#allocation5 + $0xc0] ss:$8 sps:$4 sm:$0xff]   ;;  %v2988_v27 = vld [vmem:[#allocation5 + $0xd4] ss:$8 sps:$4 sm:$0xff]   ;;  %v2990_v28 = vld [vmem:[#allocation5 + $0xd0] ss:$8 sps:$4 sm:$0xff]  }
  0xa6   : > { %813 = vmatpush1.bf16.msra.mxu0 %v2957_v5  ;;  %v2991_v29 = vld [vmem:[#allocation5 + $0xe4] ss:$8 sps:$4 sm:$0xff]   ;;  %v2993_v30 = vld [vmem:[#allocation5 + $0xe0] ss:$8 sps:$4 sm:$0xff]   ;;  %v2994_v31 = vld [vmem:[#allocation5 + $0xf4] ss:$8 sps:$4 sm:$0xff]  }
  0xa7   : > { %814 = vmatprep.subr.bf16.mxu0 %v2958_v6  ;;  %v3045_v32 = vld [vmem:[#allocation7 + $0x4] ss:$8 sps:$4 sm:$0xff]   ;;  %v3047_v33 = vld [vmem:[#allocation7] ss:$8 sps:$4 sm:$0xff]   ;;  %v3048_v34 = vld [vmem:[#allocation7 + $0x14] ss:$8 sps:$4 sm:$0xff]  }
  0xa8   : > { %v2996_v35 = vld [vmem:[#allocation5 + $0xf0] ss:$8 sps:$4 sm:$0xff]   ;;  %1301 = vmatprep.subr.bf16.mxu1 %v3045_v32  ;;  %v2997_v37 = vld [vmem:[%s3697_s29] ss:$8 sps:$4 sm:$0xff]   ;;  %v3051_v38 = vld [vmem:[#allocation7 + $0x24] ss:$8 sps:$4 sm:$0xff]  }
  0xa9   : > { %1302 = vmatpush1.bf16.msra.mxu1 %v3047_v33  ;;  %v3050_v36 = vld [vmem:[#allocation7 + $0x10] ss:$8 sps:$4 sm:$0xff]   ;;  %v3000_v39 = vld [vmem:[%s3697_s29 + $0x14] ss:$8 sps:$4 sm:$0xff]   ;;  %v3053_v40 = vld [vmem:[#allocation7 + $0x20] ss:$8 sps:$4 sm:$0xff]  }
  0xaa   : > { %815 = vmatpush1.bf16.msra.mxu0 %v2960_v7  ;;  %1303 = vmatprep.subr.bf16.mxu1 %v3048_v34  ;;  %v3054_v41 = vld [vmem:[#allocation7 + $0x34] ss:$8 sps:$4 sm:$0xff]   ;;  %v3056_v42 = vld [vmem:[#allocation7 + $0x30] ss:$8 sps:$4 sm:$0xff]   ;;  %v3057_v44 = vld [vmem:[#allocation7 + $0x44] ss:$8 sps:$4 sm:$0xff]   ;;  %v478_v34 = vlaneseq }
  0xab   : > { %816 = vmatprep.subr.bf16.mxu0 %v2961_v8  ;;  %v3002_v43 = vld [vmem:[%s3697_s29 + $0x10] ss:$8 sps:$4 sm:$0xff]   ;;  %v3003_v45 = vld [vmem:[%s3697_s29 + $0x24] ss:$8 sps:$4 sm:$0xff]   ;;  %v3059_v46 = vld [vmem:[#allocation7 + $0x40] ss:$8 sps:$4 sm:$0xff]  }
  0xac   : > { %v3060_v47 = vld [vmem:[#allocation7 + $0x54] ss:$8 sps:$4 sm:$0xff]   ;;  %v3062_v48 = vld [vmem:[#allocation7 + $0x50] ss:$8 sps:$4 sm:$0xff]   ;;  %v3005_v49 = vld [vmem:[%s3697_s29 + $0x20] ss:$8 sps:$4 sm:$0xff]  }
  0xad   : > { %1304 = vmatpush1.bf16.msra.mxu1 %v3050_v36  ;;  %v3063_v50 = vld [vmem:[#allocation7 + $0x64] ss:$8 sps:$4 sm:$0xff]   ;;  %v3006_v51 = vld [vmem:[%s3697_s29 + $0x34] ss:$8 sps:$4 sm:$0xff]   ;;  %v3065_v52 = vld [vmem:[#allocation7 + $0x60] ss:$8 sps:$4 sm:$0xff]  }
  0xae   : > { %817 = vmatpush1.bf16.msra.mxu0 %v2963_v9  ;;  %1305 = vmatprep.subr.bf16.mxu1 %v3051_v38  ;;  %v3066_v53 = vld [vmem:[#allocation7 + $0x74] ss:$8 sps:$4 sm:$0xff]   ;;  %v3068_v54 = vld [vmem:[#allocation7 + $0x70] ss:$8 sps:$4 sm:$0xff]   ;;  %v3069_v56 = vld [vmem:[#allocation7 + $0x84] ss:$8 sps:$4 sm:$0xff]  }
  0xaf   : > { %818 = vmatprep.subr.bf16.mxu0 %v2964_v10  ;;  %v3008_v55 = vld [vmem:[%s3697_s29 + $0x30] ss:$8 sps:$4 sm:$0xff]   ;;  %v3009_v57 = vld [vmem:[%s3697_s29 + $0x44] ss:$8 sps:$4 sm:$0xff]   ;;  %v3071_v58 = vld [vmem:[#allocation7 + $0x80] ss:$8 sps:$4 sm:$0xff]  }
  0xb0   : > { %v3072_v59 = vld [vmem:[#allocation7 + $0x94] ss:$8 sps:$4 sm:$0xff]   ;;  %v3074_v60 = vld [vmem:[#allocation7 + $0x90] ss:$8 sps:$4 sm:$0xff]   ;;  %v3011_v61 = vld [vmem:[%s3697_s29 + $0x40] ss:$8 sps:$4 sm:$0xff]  }
  0xb1   : > { %1306 = vmatpush1.bf16.msra.mxu1 %v3053_v40  ;;  %v3075_v62 = vld [vmem:[#allocation7 + $0xa4] ss:$8 sps:$4 sm:$0xff]   ;;  %v3012_v63 = vld [vmem:[%s3697_s29 + $0x54] ss:$8 sps:$4 sm:$0xff]   ;;  %v3077_v0 = vld [vmem:[#allocation7 + $0xa0] ss:$8 sps:$4 sm:$0xff]  }
  0xb2   : > { %819 = vmatpush1.bf16.msra.mxu0 %v2966_v11  ;;  %1307 = vmatprep.subr.bf16.mxu1 %v3054_v41  ;;  %v3078_v1 = vld [vmem:[#allocation7 + $0xb4] ss:$8 sps:$4 sm:$0xff]   ;;  %v3080_v2 = vld [vmem:[#allocation7 + $0xb0] ss:$8 sps:$4 sm:$0xff]   ;;  %v3081_v4 = vld [vmem:[#allocation7 + $0xc4] ss:$8 sps:$4 sm:$0xff]  }
  0xb3   : > { %820 = vmatprep.subr.bf16.mxu0 %v2967_v12  ;;  %v3014_v3 = vld [vmem:[%s3697_s29 + $0x50] ss:$8 sps:$4 sm:$0xff]   ;;  %v3015_v5 = vld [vmem:[%s3697_s29 + $0x64] ss:$8 sps:$4 sm:$0xff]   ;;  %v3083_v6 = vld [vmem:[#allocation7 + $0xc0] ss:$8 sps:$4 sm:$0xff]  }
  0xb4   : > { %v3084_v7 = vld [vmem:[#allocation7 + $0xd4] ss:$8 sps:$4 sm:$0xff]   ;;  %v3017_v8 = vld [vmem:[%s3697_s29 + $0x60] ss:$8 sps:$4 sm:$0xff]   ;;  %v3020_v10 = vld [vmem:[%s3697_s29 + $0x70] ss:$8 sps:$4 sm:$0xff]  }
  0xb5   : > { %1308 = vmatpush1.bf16.msra.mxu1 %v3056_v42  ;;  %v3018_v9 = vld [vmem:[%s3697_s29 + $0x74] ss:$8 sps:$4 sm:$0xff]   ;;  %v3021_v11 = vld [vmem:[%s3697_s29 + $0x84] ss:$8 sps:$4 sm:$0xff]   ;;  %v3023_v12 = vld [vmem:[%s3697_s29 + $0x80] ss:$8 sps:$4 sm:$0xff]  }
  0xb6   : > { %821 = vmatpush1.bf16.msra.mxu0 %v2969_v14  ;;  %1309 = vmatprep.subr.bf16.mxu1 %v3057_v44  ;;  %v3024_v13 = vld [vmem:[%s3697_s29 + $0x94] ss:$8 sps:$4 sm:$0xff]   ;;  %v3026_v14 = vld [vmem:[%s3697_s29 + $0x90] ss:$8 sps:$4 sm:$0xff]   ;;  %v3093_v32 = vld [vmem:[#allocation8] ss:$8 sps:$4 sm:$0xff]  }
  0xb7   : > { %822 = vmatprep.subr.bf16.mxu0 %v2970_v15  ;;  %v3027_v15 = vld [vmem:[%s3697_s29 + $0xa4] ss:$8 sps:$4 sm:$0xff]   ;;  %v3098_v36 = vld [vmem:[#allocation8 + $0x14] ss:$8 sps:$4 sm:$0xff]   ;;  %v3099_v41 = vld [vmem:[#allocation8 + $0x20] ss:$8 sps:$4 sm:$0xff]  }
  0xb8   : > { %v3095_v33 = vld [vmem:[#allocation8 + $0x4] ss:$8 sps:$4 sm:$0xff]   ;;  %s2687_s18 = sshll.u32 %s3693_s30, 9  ;;  %s2857_s23 = sshll.u32 %s3488_s13, 13 }
  0xb9   : > { %1310 = vmatpush1.bf16.msra.mxu1 %v3059_v46  ;;  %v3101_v42 = vld [vmem:[#allocation8 + $0x24] ss:$8 sps:$4 sm:$0xff]   ;;  %v3102_v46 = vld [vmem:[#allocation8 + $0x30] ss:$8 sps:$4 sm:$0xff]   ;;  %s3978_s16 = scalar_lea.vmem [#allocation11], %s2687_s18  ;;  %s4190_s15 = sld [smem:[#allocation18_spill]] }
  0xba   : > { %823 = vmatpush1.bf16.msra.mxu0 %v2972_v16  ;;  %1311 = vmatprep.subr.bf16.mxu1 %v3060_v47  ;;  %v3029_v16 = vld [vmem:[%s3697_s29 + $0xa0] ss:$8 sps:$4 sm:$0xff]   ;;  %v3104_v47 = vld [vmem:[#allocation8 + $0x34] ss:$8 sps:$4 sm:$0xff]   ;;  %s2559_s21 = sshll.u32 %s3978_s16, 4  ;;  %s2545_s13 = scalar_lea.sflag [#allocation4], %s3693_s30  ;;  %s4109_s21 = int_to_ptr.vmem [resolvable:$true] %s2559_s21 }
  0xbb   : > { %824 = vmatprep.subr.bf16.mxu0 %v2973_v17  ;;  %v3030_v17 = vld [vmem:[%s3697_s29 + $0xb4] ss:$8 sps:$4 sm:$0xff]   ;;  %s3331_s25 = scalar_lea.vmem %s4109_s21, 8192  ;;  %s3414_s26 = smov [#allocation11]  }
  0xbc   : > { %p3332_p3 = scmp.ne.s32.totalorder %s4109_s21, %s3331_s25  ;;  %s3335_s19 = sshll.u32 %s3414_s26, 4  ;;  %s3336_s19 = int_to_ptr.vmem [resolvable:$false] %s3335_s19 }
  0xbd   : > { %1312 = vmatpush1.bf16.msra.mxu1 %v3062_v48  ;;  %s3337_s22 = scalar_lea.vmem %s3336_s19, 16384  ;;  %p3338_p12 = scmp.lt.s32.totalorder %s4109_s21, %s3336_s19 }
  0xbe   : > { %825 = vmatpush1.bf16.msra.mxu0 %v2975_v18  ;;  %1313 = vmatprep.subr.bf16.mxu1 %v3063_v50  ;;  %v3086_v18 = vld [vmem:[#allocation7 + $0xd0] ss:$8 sps:$4 sm:$0xff]   ;;  %p3333_p5 = pnand %p3332_p3, %p3638_p10  ;;  %p3339_p1 = scmp.lt.s32.totalorder %s3337_s22, %s3331_s25 }
  0xbf   : > { %826 = vmatprep.subr.bf16.mxu0 %v2976_v19  ;;  %v3032_v19 = vld [vmem:[%s3697_s29 + $0xb0] ss:$8 sps:$4 sm:$0xff]   ;;  %s4107_s17 = scalar_lea.hbm %s4190_s15, %s2857_s23 }
  0xc0   : > { %p3334_p7 = pneg %p3333_p5  ;;  %p3340_p2 = por %p3339_p1, %p3338_p12 }
  0xc1   : > { %1314 = vmatpush1.bf16.msra.mxu1 %v3065_v52 }
  0xc2   : > { %827 = vmatpush1.bf16.msra.mxu0 %v2978_v20  ;;  %1315 = vmatprep.subr.bf16.mxu1 %v3066_v53  ;;  %v3087_v20 = vld [vmem:[#allocation7 + $0xe4] ss:$8 sps:$4 sm:$0xff]   ;;  %p3341_p13 = pnand %p3340_p2, %p3334_p7 }
  0xc3   : > { %828 = vmatprep.subr.bf16.mxu0 %v2979_v21  ;;  %v3033_v21 = vld [vmem:[%s3697_s29 + $0xc4] ss:$8 sps:$4 sm:$0xff]  }
  0xc5   : > { %1316 = vmatpush1.bf16.msra.mxu1 %v3068_v54  ;;  %v3105_v54 = vld [vmem:[#allocation8 + $0x40] ss:$8 sps:$4 sm:$0xff]  }
  0xc6   : > { %829 = vmatpush1.bf16.msra.mxu0 %v2981_v22  ;;  %1317 = vmatprep.subr.bf16.mxu1 %v3069_v56  ;;  %v3089_v22 = vld [vmem:[#allocation7 + $0xe0] ss:$8 sps:$4 sm:$0xff]  }
  0xc7   : > { %830 = vmatprep.subr.bf16.mxu0 %v2982_v23  ;;  %v3090_v23 = vld [vmem:[#allocation7 + $0xf4] ss:$8 sps:$4 sm:$0xff]  }
  0xc9   : > { %1318 = vmatpush1.bf16.msra.mxu1 %v3071_v58 }
  0xca   : > { %831 = vmatpush1.bf16.msra.mxu0 %v2984_v24  ;;  %1319 = vmatprep.subr.bf16.mxu1 %v3072_v59  ;;  %v3092_v24 = vld [vmem:[#allocation7 + $0xf0] ss:$8 sps:$4 sm:$0xff]  }
  0xcb   : > { %832 = vmatprep.subr.bf16.mxu0 %v2985_v25  ;;  %v3035_v25 = vld [vmem:[%s3697_s29 + $0xc0] ss:$8 sps:$4 sm:$0xff]  }
  0xcd   : > { %1320 = vmatpush1.bf16.msra.mxu1 %v3074_v60 }
  0xce   : > { %833 = vmatpush1.bf16.msra.mxu0 %v2987_v26  ;;  %1321 = vmatprep.subr.bf16.mxu1 %v3075_v62  ;;  %v3036_v26 = vld [vmem:[%s3697_s29 + $0xd4] ss:$8 sps:$4 sm:$0xff]  }
  0xcf   : > { %834 = vmatprep.subr.bf16.mxu0 %v2988_v27  ;;  %v3038_v27 = vld [vmem:[%s3697_s29 + $0xd0] ss:$8 sps:$4 sm:$0xff]  }
  0xd1   : > { %1322 = vmatpush1.bf16.msra.mxu1 %v3077_v0 }
  0xd2   : > { %835 = vmatpush1.bf16.msra.mxu0 %v2990_v28  ;;  %1323 = vmatprep.subr.bf16.mxu1 %v3078_v1  ;;  %v3039_v28 = vld [vmem:[%s3697_s29 + $0xe4] ss:$8 sps:$4 sm:$0xff]  }
  0xd3   : > { %836 = vmatprep.subr.bf16.mxu0 %v2991_v29  ;;  %v3041_v29 = vld [vmem:[%s3697_s29 + $0xe0] ss:$8 sps:$4 sm:$0xff]  }
  0xd5   : > { %1324 = vmatpush1.bf16.msra.mxu1 %v3080_v2  ;;  %v3113_v2 = vld [vmem:[#allocation8 + $0x64] ss:$8 sps:$4 sm:$0xff]  }
  0xd6   : > { %837 = vmatpush1.bf16.msra.mxu0 %v2993_v30  ;;  %1325 = vmatprep.subr.bf16.mxu1 %v3081_v4  ;;  %v3042_v30 = vld [vmem:[%s3697_s29 + $0xf4] ss:$8 sps:$4 sm:$0xff]  }
  0xd7   : > { %838 = vmatprep.subr.bf16.mxu0 %v2994_v31  ;;  %v3044_v31 = vld [vmem:[%s3697_s29 + $0xf0] ss:$8 sps:$4 sm:$0xff]  }
  0xd9   : > { %1326 = vmatpush1.bf16.msra.mxu1 %v3083_v6 }
  0xda   : > { %839 = vmatpush1.bf16.msra.mxu0 %v2996_v35  ;;  %1327 = vmatprep.subr.bf16.mxu1 %v3084_v7  ;;  %v3096_v35 = vld [vmem:[#allocation8 + $0x10] ss:$8 sps:$4 sm:$0xff]  }
  0xdb   : > { %1794 = vmatprep.subr.bf16.mxu0 %v3095_v33 }
  0xdd   : > { %841 = vmatmul.mubr.bf16.vlgmr.msra.gmra.mrb[0].mxu0 %v2997_v37  ;;  %1328 = vmatpush1.bf16.msra.mxu1 %v3086_v18  ;;  %v479_v37 = vshrl.u32 %v478_v34, 7 }
  0xde   : > { %850 = vmatprep.mubr.bf16.mxu0 %v3000_v39  ;;  %1329 = vmatprep.subr.bf16.mxu1 %v3087_v20  ;;  %v476_v39 = vld [vmem:[%s4159_s2] sm:$0x3]  ;;  %v3119_v20 = vld [vmem:[#allocation8 + $0x84] ss:$8 sps:$4 sm:$0xff]  }
  0xdf   : > { %1795 = vmatpush1.bf16.msra.mxu0 %v3093_v32  ;;  %v3743_v38 = vsub.s32 0, %v479_v37  ;;  %v3748_v40 = vsub.s32 1, %v479_v37 }
  0xe0   : > { %1796 = vmatprep.subr.bf16.mxu0 %v3098_v36 }
  0xe1   : > { %1330 = vmatpush1.bf16.msra.mxu1 %v3089_v22  ;;  %v3754_v44 = vrot.slane %v476_v39, %v3748_v40 }
  0xe2   : > { %1331 = vmatprep.subr.bf16.mxu1 %v3090_v23 }
  0xe3   : > { %1797 = vmatpush1.bf16.msra.mxu0 %v3096_v35  ;;  %v3120_v35 = vld [vmem:[#allocation8 + $0x90] ss:$8 sps:$4 sm:$0xff]  }
  0xe4   : > { %1798 = vmatprep.subr.bf16.mxu0 %v3101_v42 }
  0xe5   : > { %851 = vmatmul.mubr.bf16.gmra.mrb[4].mxu0 %v3002_v43  ;;  %1332 = vmatpush1.bf16.msra.mxu1 %v3092_v24  ;;  %v3751_v43 = vrot.slane %v476_v39, %v3743_v38  ;;  %v3125_v39 = vld [vmem:[#allocation8 + $0xa4] ss:$8 sps:$4 sm:$0xff]  }
  0xe6   : > { %860 = vmatprep.mubr.bf16.mxu0 %v3003_v45 }
  0xe7   : > { %1799 = vmatpush1.bf16.msra.mxu0 %v3099_v41 }
  0xe8   : > { %1800 = vmatprep.subr.bf16.mxu0 %v3104_v47 }
  0xeb   : > { %1801 = vmatpush1.bf16.msra.mxu0 %v3102_v46 }
  0xed   : > { %861 = vmatmul.mubr.bf16.gmra.mrb[8].mxu0 %v3005_v49 }
  0xee   : > { %870 = vmatprep.mubr.bf16.mxu0 %v3006_v51 }
  0xf5   : > { %871 = vmatmul.mubr.bf16.gmra.mrb[12].mxu0 %v3008_v55  ;;  %v3107_v55 = vld [vmem:[#allocation8 + $0x44] ss:$8 sps:$4 sm:$0xff]  }
  0xf6   : > { %880 = vmatprep.mubr.bf16.mxu0 %v3009_v57  ;;  %v3110_v57 = vld [vmem:[#allocation8 + $0x54] ss:$8 sps:$4 sm:$0xff]   ;;  %1802 = vmatprep.subr.bf16.mxu0 %v3107_v55 }
  0xf7   : > { %1803 = vmatpush1.bf16.msra.mxu0 %v3105_v54 }
  0xf8   : > { %1804 = vmatprep.subr.bf16.mxu0 %v3110_v57  ;;  %v3126_v57 = vld [vmem:[#allocation8 + $0xb0] ss:$8 sps:$4 sm:$0xff]  }
  0xfd   : > { %881 = vmatmul.mubr.bf16.gmra.mrb[16].mxu0 %v3011_v61 }
  0xfe   : > { %890 = vmatprep.mubr.bf16.mxu0 %v3012_v63  ;;  %v3108_v63 = vld [vmem:[#allocation8 + $0x50] ss:$8 sps:$4 sm:$0xff]  }
  0xff   : > { %1805 = vmatpush1.bf16.msra.mxu0 %v3108_v63 }
 0x100   : > { %1806 = vmatprep.subr.bf16.mxu0 %v3113_v2 }
 0x105   : > { %891 = vmatmul.mubr.bf16.gmra.mrb[20].mxu0 %v3014_v3 }
 0x106   : > { %900 = vmatprep.mubr.bf16.mxu0 %v3015_v5 }
 0x10d   : > { %901 = vmatmul.mubr.bf16.gmra.mrb[24].mxu0 %v3017_v8 }
 0x10e   : > { %910 = vmatprep.mubr.bf16.mxu0 %v3018_v9  ;;  %v3111_v9 = vld [vmem:[#allocation8 + $0x60] ss:$8 sps:$4 sm:$0xff]  }
 0x10f   : > { %1807 = vmatpush1.bf16.msra.mxu0 %v3111_v9 }
 0x115   : > { %911 = vmatmul.mubr.bf16.gmra.mrb[28].mxu0 %v3020_v10 }
 0x116   : > { %920 = vmatprep.mubr.bf16.mxu0 %v3021_v11  ;;  %v3116_v11 = vld [vmem:[#allocation8 + $0x74] ss:$8 sps:$4 sm:$0xff]  }
 0x117   : > { %1808 = vmatprep.subr.bf16.mxu0 %v3116_v11  ;;  %v3132_v11 = vld [vmem:[#allocation8 + $0xd0] ss:$8 sps:$4 sm:$0xff]  }
 0x11d   : > { %921 = vmatmul.mubr.bf16.gmra.mrb[32].mxu0 %v3023_v12 }
 0x11e   : > { %930 = vmatprep.mubr.bf16.mxu0 %v3024_v13 }
 0x125   : > { %931 = vmatmul.mubr.bf16.gmra.mrb[36].mxu0 %v3026_v14 }
 0x126   : > { %940 = vmatprep.mubr.bf16.mxu0 %v3027_v15 }
 0x12d   : > { %941 = vmatmul.mubr.bf16.gmra.mrb[40].mxu0 %v3029_v16 }
 0x12e   : > { %950 = vmatprep.mubr.bf16.mxu0 %v3030_v17  ;;  %v3114_v17 = vld [vmem:[#allocation8 + $0x70] ss:$8 sps:$4 sm:$0xff]  }
 0x12f   : > { %1809 = vmatpush1.bf16.msra.mxu0 %v3114_v17 }
 0x130   : > { %1810 = vmatprep.subr.bf16.mxu0 %v3119_v20 }
 0x135   : > { %951 = vmatmul.mubr.bf16.gmra.mrb[44].mxu0 %v3032_v19 }
 0x136   : > { %960 = vmatprep.mubr.bf16.mxu0 %v3033_v21 }
 0x13d   : > { %961 = vmatmul.mubr.bf16.gmra.mrb[48].mxu0 %v3035_v25 }
 0x13e   : > { %970 = vmatprep.mubr.bf16.mxu0 %v3036_v26 }
 0x145   : > { %971 = vmatmul.mubr.bf16.gmra.mrb[52].mxu0 %v3038_v27  ;;  %v3117_v27 = vld [vmem:[#allocation8 + $0x80] ss:$8 sps:$4 sm:$0xff]  }
 0x146   : > { %980 = vmatprep.mubr.bf16.mxu0 %v3039_v28  ;;  %1811 = vmatpush1.bf16.msra.mxu0 %v3117_v27 }
 0x14d   : > { %981 = vmatmul.mubr.bf16.gmra.mrb[56].mxu0 %v3041_v29  ;;  %v3122_v29 = vld [vmem:[#allocation8 + $0x94] ss:$8 sps:$4 sm:$0xff]  }
 0x14e   : > { %990 = vmatprep.mubr.bf16.mxu0 %v3042_v30  ;;  %1812 = vmatprep.subr.bf16.mxu0 %v3122_v29 }
 0x14f   : > { %1813 = vmatpush1.bf16.msra.mxu0 %v3120_v35 }
 0x150   : > { %1814 = vmatprep.subr.bf16.mxu0 %v3125_v39 }
 0x155   : > { %991 = vmatmul.mubr.bf16.gmra.mrb[60].mxu0 %v3044_v31 }
 0x1b0   : > { %v842_v45 = vpop.f32.mrb[0].mxu0 }
 0x1b1   : > { %v843_v48 = vadd.f32 %v842_v45, %v3751_v43  ;;  %v844_v49 = vpop.f32.mrb[1].mxu0 }
 0x1b2   : > { %v845_v50 = vadd.f32 %v844_v49, %v3754_v44  ;;  %v846_v51 = vpop.f32.mrb[2].mxu0  ;;  %v3123_v49 = vld [vmem:[#allocation8 + $0xa0] ss:$8 sps:$4 sm:$0xff]  }
 0x1b3   : > { %v847_v52 = vadd.f32 %v846_v51, %v3751_v43  ;;  %v848_v53 = vpop.f32.mrb[3].mxu0  ;;  %v1001_v58 = vmax.f32 %v843_v48, 0.0  ;;  %v3128_v51 = vld [vmem:[#allocation8 + $0xb4] ss:$8 sps:$4 sm:$0xff]   ;;  %1815 = vmatpush1.bf16.msra.mxu0 %v3123_v49 }
 0x1b4   : > { %v849_v56 = vadd.f32 %v848_v53, %v3754_v44  ;;  %v1002_v60 = vmax.f32 %v845_v50, 0.0  ;;  %1816 = vmatprep.subr.bf16.mxu0 %v3128_v51 }
 0x1b5   : > { %v1003_v59 = vmax.f32 %v847_v52, 0.0 }
 0x1b6   : > { %v1004_v61 = vmax.f32 %v849_v56, 0.0 }
 0x1b7   : > { %v1098_v62 = vpack.c.bf16 %v1003_v59, %v1001_v58  ;;  %1817 = vmatpush1.bf16.msra.mxu0 %v3126_v57 }
 0x1b8   : > { %v852_v0 = vpop.f32.mrb[4].mxu0  ;;  %v1099_v1 = vpack.c.bf16 %v1004_v61, %v1002_v60  ;;  %v3131_v60 = vld [vmem:[#allocation8 + $0xc4] ss:$8 sps:$4 sm:$0xff]  }
 0x1b9   : > { %v853_v3 = vadd.f32 %v852_v0, %v3751_v43  ;;  %v854_v4 = vpop.f32.mrb[5].mxu0  ;;  %1818 = vmatprep.subr.bf16.mxu0 %v3131_v60 }
 0x1ba   : > { %v855_v5 = vadd.f32 %v854_v4, %v3754_v44  ;;  %v856_v6 = vpop.f32.mrb[6].mxu0  ;;  %1333 = vmatprep.mubr.bf16.mxu1 %v1099_v1 }
 0x1bb   : > { %v857_v7 = vadd.f32 %v856_v6, %v3751_v43  ;;  %v858_v8 = vpop.f32.mrb[7].mxu0  ;;  %1334 = vmatmul.mubr.bf16.vlgmr.msra.gmra.mrb[0].mxu1 %v1098_v62  ;;  %v1005_v12 = vmax.f32 %v853_v3, 0.0  ;;  %v3129_v3 = vld [vmem:[#allocation8 + $0xc0] ss:$8 sps:$4 sm:$0xff]  }
 0x1bc   : > { %v859_v10 = vadd.f32 %v858_v8, %v3754_v44  ;;  %v1006_v14 = vmax.f32 %v855_v5, 0.0  ;;  %v3134_v5 = vld [vmem:[#allocation8 + $0xd4] ss:$8 sps:$4 sm:$0xff]   ;;  %1819 = vmatpush1.bf16.msra.mxu0 %v3129_v3 }
 0x1bd   : > { %v1007_v13 = vmax.f32 %v857_v7, 0.0  ;;  %1820 = vmatprep.subr.bf16.mxu0 %v3134_v5 }
 0x1be   : > { %v1008_v15 = vmax.f32 %v859_v10, 0.0 }
 0x1bf   : > { %v1100_v16 = vpack.c.bf16 %v1007_v13, %v1005_v12 }
 0x1c0   : > { %v1101_v18 = vpack.c.bf16 %v1008_v15, %v1006_v14  ;;  %v862_v19 = vpop.f32.mrb[8].mxu0  ;;  %v3137_v14 = vld [vmem:[#allocation8 + $0xe4] ss:$8 sps:$4 sm:$0xff]   ;;  %1821 = vmatpush1.bf16.msra.mxu0 %v3132_v11 }
 0x1c1   : > { %v863_v21 = vadd.f32 %v862_v19, %v3751_v43  ;;  %v864_v22 = vpop.f32.mrb[9].mxu0  ;;  %1822 = vmatprep.subr.bf16.mxu0 %v3137_v14 }
 0x1c2   : > { %v865_v23 = vadd.f32 %v864_v22, %v3754_v44  ;;  %v866_v24 = vpop.f32.mrb[10].mxu0  ;;  %1343 = vmatprep.mubr.bf16.mxu1 %v1101_v18 }
 0x1c3   : > { %v867_v25 = vadd.f32 %v866_v24, %v3751_v43  ;;  %v868_v26 = vpop.f32.mrb[11].mxu0  ;;  %1344 = vmatmul.mubr.bf16.gmra.mrb[4].mxu1 %v1100_v16  ;;  %v1009_v30 = vmax.f32 %v863_v21, 0.0  ;;  %v3135_v21 = vld [vmem:[#allocation8 + $0xe0] ss:$8 sps:$4 sm:$0xff]  }
 0x1c4   : > { %v869_v28 = vadd.f32 %v868_v26, %v3754_v44  ;;  %v1010_v32 = vmax.f32 %v865_v23, 0.0  ;;  %1823 = vmatpush1.bf16.msra.mxu0 %v3135_v21 }
 0x1c5   : > { %v1011_v31 = vmax.f32 %v867_v25, 0.0 }
 0x1c6   : > { %v1012_v33 = vmax.f32 %v869_v28, 0.0 }
 0x1c7   : > { %v1102_v34 = vpack.c.bf16 %v1011_v31, %v1009_v30 }
 0x1c8   : > { %v1103_v36 = vpack.c.bf16 %v1012_v33, %v1010_v32  ;;  %v872_v37 = vpop.f32.mrb[12].mxu0 }
 0x1c9   : > { %v873_v41 = vadd.f32 %v872_v37, %v3751_v43  ;;  %v874_v42 = vpop.f32.mrb[13].mxu0 }
 0x1ca   : > { %v875_v45 = vadd.f32 %v874_v42, %v3754_v44  ;;  %v876_v46 = vpop.f32.mrb[14].mxu0  ;;  %1353 = vmatprep.mubr.bf16.mxu1 %v1103_v36 }
 0x1cb   : > { %v877_v47 = vadd.f32 %v876_v46, %v3751_v43  ;;  %v878_v48 = vpop.f32.mrb[15].mxu0  ;;  %1354 = vmatmul.mubr.bf16.gmra.mrb[8].mxu1 %v1102_v34  ;;  %v1013_v52 = vmax.f32 %v873_v41, 0.0 }
 0x1cc   : > { %v879_v50 = vadd.f32 %v878_v48, %v3754_v44  ;;  %v1014_v54 = vmax.f32 %v875_v45, 0.0 }
 0x1cd   : > { %v1015_v53 = vmax.f32 %v877_v47, 0.0 }
 0x1ce   : > { %v1016_v55 = vmax.f32 %v879_v50, 0.0 }
 0x1cf   : > { %v1104_v56 = vpack.c.bf16 %v1015_v53, %v1013_v52 }
 0x1d0   : > { %v1105_v58 = vpack.c.bf16 %v1016_v55, %v1014_v54  ;;  %v882_v59 = vpop.f32.mrb[16].mxu0 }
 0x1d1   : > { %v883_v61 = vadd.f32 %v882_v59, %v3751_v43  ;;  %v884_v62 = vpop.f32.mrb[17].mxu0 }
 0x1d2   : > { %v885_v63 = vadd.f32 %v884_v62, %v3754_v44  ;;  %v886_v0 = vpop.f32.mrb[18].mxu0  ;;  %1363 = vmatprep.mubr.bf16.mxu1 %v1105_v58 }
 0x1d3   : > { %v887_v1 = vadd.f32 %v886_v0, %v3751_v43  ;;  %v888_v2 = vpop.f32.mrb[19].mxu0  ;;  %1364 = vmatmul.mubr.bf16.gmra.mrb[12].mxu1 %v1104_v56  ;;  %v1017_v6 = vmax.f32 %v883_v61, 0.0 }
 0x1d4   : > { %v889_v4 = vadd.f32 %v888_v2, %v3754_v44  ;;  %v1018_v8 = vmax.f32 %v885_v63, 0.0 }
 0x1d5   : > { %v1019_v7 = vmax.f32 %v887_v1, 0.0 }
 0x1d6   : > { %v1020_v9 = vmax.f32 %v889_v4, 0.0 }
 0x1d7   : > { %v1106_v10 = vpack.c.bf16 %v1019_v7, %v1017_v6 }
 0x1d8   : > { %v1107_v12 = vpack.c.bf16 %v1020_v9, %v1018_v8  ;;  %v892_v13 = vpop.f32.mrb[20].mxu0 }
 0x1d9   : > { %v893_v15 = vadd.f32 %v892_v13, %v3751_v43  ;;  %v894_v16 = vpop.f32.mrb[21].mxu0 }
 0x1da   : > { %v895_v17 = vadd.f32 %v894_v16, %v3754_v44  ;;  %v896_v18 = vpop.f32.mrb[22].mxu0  ;;  %1373 = vmatprep.mubr.bf16.mxu1 %v1107_v12 }
 0x1db   : > { %v897_v19 = vadd.f32 %v896_v18, %v3751_v43  ;;  %v898_v20 = vpop.f32.mrb[23].mxu0  ;;  %1374 = vmatmul.mubr.bf16.gmra.mrb[16].mxu1 %v1106_v10  ;;  %v1021_v23 = vmax.f32 %v893_v15, 0.0 }
 0x1dc   : > { %v899_v22 = vadd.f32 %v898_v20, %v3754_v44  ;;  %v1022_v25 = vmax.f32 %v895_v17, 0.0 }
 0x1dd   : > { %v1023_v24 = vmax.f32 %v897_v19, 0.0 }
 0x1de   : > { %v1024_v26 = vmax.f32 %v899_v22, 0.0 }
 0x1df   : > { %v1108_v27 = vpack.c.bf16 %v1023_v24, %v1021_v23 }
 0x1e0   : > { %v1109_v28 = vpack.c.bf16 %v1024_v26, %v1022_v25  ;;  %v902_v29 = vpop.f32.mrb[24].mxu0 }
 0x1e1   : > { %v903_v30 = vadd.f32 %v902_v29, %v3751_v43  ;;  %v904_v31 = vpop.f32.mrb[25].mxu0 }
 0x1e2   : > { %v905_v32 = vadd.f32 %v904_v31, %v3754_v44  ;;  %v906_v33 = vpop.f32.mrb[26].mxu0  ;;  %1383 = vmatprep.mubr.bf16.mxu1 %v1109_v28 }
 0x1e3   : > { %v907_v34 = vadd.f32 %v906_v33, %v3751_v43  ;;  %v908_v35 = vpop.f32.mrb[27].mxu0  ;;  %1384 = vmatmul.mubr.bf16.gmra.mrb[20].mxu1 %v1108_v27  ;;  %v1025_v37 = vmax.f32 %v903_v30, 0.0 }
 0x1e4   : > { %v909_v36 = vadd.f32 %v908_v35, %v3754_v44  ;;  %v1026_v41 = vmax.f32 %v905_v32, 0.0 }
 0x1e5   : > { %v1027_v39 = vmax.f32 %v907_v34, 0.0 }
 0x1e6   : > { %v1028_v42 = vmax.f32 %v909_v36, 0.0 }
 0x1e7   : > { %v1110_v45 = vpack.c.bf16 %v1027_v39, %v1025_v37 }
 0x1e8   : > { %v1111_v46 = vpack.c.bf16 %v1028_v42, %v1026_v41  ;;  %v912_v47 = vpop.f32.mrb[28].mxu0 }
 0x1e9   : > { %v913_v48 = vadd.f32 %v912_v47, %v3751_v43  ;;  %v914_v49 = vpop.f32.mrb[29].mxu0 }
 0x1ea   : > { %v915_v50 = vadd.f32 %v914_v49, %v3754_v44  ;;  %v916_v51 = vpop.f32.mrb[30].mxu0  ;;  %1393 = vmatprep.mubr.bf16.mxu1 %v1111_v46 }
 0x1eb   : > { %v917_v52 = vadd.f32 %v916_v51, %v3751_v43  ;;  %v918_v53 = vpop.f32.mrb[31].mxu0  ;;  %1394 = vmatmul.mubr.bf16.gmra.mrb[24].mxu1 %v1110_v45  ;;  %v1029_v55 = vmax.f32 %v913_v48, 0.0 }
 0x1ec   : > { %v919_v54 = vadd.f32 %v918_v53, %v3754_v44  ;;  %v1030_v57 = vmax.f32 %v915_v50, 0.0 }
 0x1ed   : > { %v1031_v56 = vmax.f32 %v917_v52, 0.0 }
 0x1ee   : > { %v1032_v58 = vmax.f32 %v919_v54, 0.0 }
 0x1ef   : > { %v1112_v59 = vpack.c.bf16 %v1031_v56, %v1029_v55 }
 0x1f0   : > { %v1113_v60 = vpack.c.bf16 %v1032_v58, %v1030_v57  ;;  %v922_v61 = vpop.f32.mrb[32].mxu0 }
 0x1f1   : > { %v923_v62 = vadd.f32 %v922_v61, %v3751_v43  ;;  %v924_v63 = vpop.f32.mrb[33].mxu0 }
 0x1f2   : > { %v925_v0 = vadd.f32 %v924_v63, %v3754_v44  ;;  %v926_v1 = vpop.f32.mrb[34].mxu0  ;;  %1403 = vmatprep.mubr.bf16.mxu1 %v1113_v60 }
 0x1f3   : > { %v927_v2 = vadd.f32 %v926_v1, %v3751_v43  ;;  %v928_v3 = vpop.f32.mrb[35].mxu0  ;;  %1404 = vmatmul.mubr.bf16.gmra.mrb[28].mxu1 %v1112_v59  ;;  %v1033_v5 = vmax.f32 %v923_v62, 0.0 }
 0x1f4   : > { %v929_v4 = vadd.f32 %v928_v3, %v3754_v44  ;;  %v1034_v7 = vmax.f32 %v925_v0, 0.0  ;;  %v3140_v0 = vld [vmem:[#allocation8 + $0xf4] ss:$8 sps:$4 sm:$0xff]  }
 0x1f5   : > { %v1035_v6 = vmax.f32 %v927_v2, 0.0  ;;  %v3138_v2 = vld [vmem:[#allocation8 + $0xf0] ss:$8 sps:$4 sm:$0xff]   ;;  %1824 = vmatprep.subr.bf16.mxu0 %v3140_v0  ;;  %v3152_v0 = vld [vmem:[#allocation10 + $0x34] ss:$8 sps:$4 sm:$0xff]  }
 0x1f6   : > { %v1036_v8 = vmax.f32 %v929_v4, 0.0  ;;  %1825 = vmatpush1.bf16.msra.mxu0 %v3138_v2 }
 0x1f7   : > { %v1114_v9 = vpack.c.bf16 %v1035_v6, %v1033_v5 }
 0x1f8   : > { %v1115_v10 = vpack.c.bf16 %v1036_v8, %v1034_v7  ;;  %v932_v11 = vpop.f32.mrb[36].mxu0 }
 0x1f9   : > { %v933_v12 = vadd.f32 %v932_v11, %v3751_v43  ;;  %v934_v13 = vpop.f32.mrb[37].mxu0 }
 0x1fa   : > { %v935_v14 = vadd.f32 %v934_v13, %v3754_v44  ;;  %v936_v15 = vpop.f32.mrb[38].mxu0  ;;  %1413 = vmatprep.mubr.bf16.mxu1 %v1115_v10 }
 0x1fb   : > { %v937_v16 = vadd.f32 %v936_v15, %v3751_v43  ;;  %v938_v17 = vpop.f32.mrb[39].mxu0  ;;  %1414 = vmatmul.mubr.bf16.gmra.mrb[32].mxu1 %v1114_v9  ;;  %v1037_v19 = vmax.f32 %v933_v12, 0.0 }
 0x1fc   : > { %v939_v18 = vadd.f32 %v938_v17, %v3754_v44  ;;  %v1038_v21 = vmax.f32 %v935_v14, 0.0 }
 0x1fd   : > { %v1039_v20 = vmax.f32 %v937_v16, 0.0 }
 0x1fe   : > { %v1040_v22 = vmax.f32 %v939_v18, 0.0 }
 0x1ff   : > { %v1116_v23 = vpack.c.bf16 %v1039_v20, %v1037_v19 }
 0x200   : > { %v1117_v24 = vpack.c.bf16 %v1040_v22, %v1038_v21  ;;  %v942_v25 = vpop.f32.mrb[40].mxu0 }
 0x201   : > { %v943_v26 = vadd.f32 %v942_v25, %v3751_v43  ;;  %v944_v27 = vpop.f32.mrb[41].mxu0 }
 0x202   : > { %v945_v28 = vadd.f32 %v944_v27, %v3754_v44  ;;  %v946_v29 = vpop.f32.mrb[42].mxu0  ;;  %1423 = vmatprep.mubr.bf16.mxu1 %v1117_v24 }
 0x203   : > { %v947_v30 = vadd.f32 %v946_v29, %v3751_v43  ;;  %v948_v31 = vpop.f32.mrb[43].mxu0  ;;  %1424 = vmatmul.mubr.bf16.gmra.mrb[36].mxu1 %v1116_v23  ;;  %v1041_v33 = vmax.f32 %v943_v26, 0.0 }
 0x204   : > { %v949_v32 = vadd.f32 %v948_v31, %v3754_v44  ;;  %v1042_v35 = vmax.f32 %v945_v28, 0.0 }
 0x205   : > { %v1043_v34 = vmax.f32 %v947_v30, 0.0 }
 0x206   : > { %v1044_v36 = vmax.f32 %v949_v32, 0.0 }
 0x207   : > { %v1118_v37 = vpack.c.bf16 %v1043_v34, %v1041_v33 }
 0x208   : > { %v1119_v39 = vpack.c.bf16 %v1044_v36, %v1042_v35  ;;  %v952_v41 = vpop.f32.mrb[44].mxu0 }
 0x209   : > { %v953_v42 = vadd.f32 %v952_v41, %v3751_v43  ;;  %v954_v45 = vpop.f32.mrb[45].mxu0 }
 0x20a   : > { %v955_v46 = vadd.f32 %v954_v45, %v3754_v44  ;;  %v956_v47 = vpop.f32.mrb[46].mxu0  ;;  %1433 = vmatprep.mubr.bf16.mxu1 %v1119_v39 }
 0x20b   : > { %v957_v48 = vadd.f32 %v956_v47, %v3751_v43  ;;  %v958_v49 = vpop.f32.mrb[47].mxu0  ;;  %1434 = vmatmul.mubr.bf16.gmra.mrb[40].mxu1 %v1118_v37  ;;  %v1045_v51 = vmax.f32 %v953_v42, 0.0 }
 0x20c   : > { %v959_v50 = vadd.f32 %v958_v49, %v3754_v44  ;;  %v1046_v53 = vmax.f32 %v955_v46, 0.0 }
 0x20d   : > { %v1047_v52 = vmax.f32 %v957_v48, 0.0 }
 0x20e   : > { %v1048_v54 = vmax.f32 %v959_v50, 0.0 }
 0x20f   : > { %v1120_v55 = vpack.c.bf16 %v1047_v52, %v1045_v51 }
 0x210   : > { %v1121_v56 = vpack.c.bf16 %v1048_v54, %v1046_v53  ;;  %v962_v57 = vpop.f32.mrb[48].mxu0 }
 0x211   : > { %v963_v58 = vadd.f32 %v962_v57, %v3751_v43  ;;  %v964_v59 = vpop.f32.mrb[49].mxu0  ;;  %v3144_v57 = vld [vmem:[#allocation10 + $0x10] ss:$8 sps:$4 sm:$0xff]  }
 0x212   : > { %v965_v60 = vadd.f32 %v964_v59, %v3754_v44  ;;  %v966_v61 = vpop.f32.mrb[50].mxu0  ;;  %1443 = vmatprep.mubr.bf16.mxu1 %v1121_v56  ;;  %v3143_v56 = vld [vmem:[#allocation10 + $0x4] ss:$8 sps:$4 sm:$0xff]  }
 0x213   : > { %v967_v62 = vadd.f32 %v966_v61, %v3751_v43  ;;  %v968_v63 = vpop.f32.mrb[51].mxu0  ;;  %1444 = vmatmul.mubr.bf16.gmra.mrb[44].mxu1 %v1120_v55  ;;  %v1049_v3 = vmax.f32 %v963_v58, 0.0  ;;  %v3141_v55 = vld [vmem:[#allocation10] ss:$8 sps:$4 sm:$0xff]   ;;  %2287 = vmatprep.subr.bf16.mxu1 %v3143_v56  ;;  %v3146_v58 = vld [vmem:[#allocation10 + $0x14] ss:$8 sps:$4 sm:$0xff]  }
 0x214   : > { %v969_v1 = vadd.f32 %v968_v63, %v3754_v44  ;;  %v1050_v5 = vmax.f32 %v965_v60, 0.0  ;;  %2288 = vmatpush1.bf16.msra.mxu1 %v3141_v55  ;;  %v3149_v59 = vld [vmem:[#allocation10 + $0x24] ss:$8 sps:$4 sm:$0xff]   ;;  %v3150_v63 = vld [vmem:[#allocation10 + $0x30] ss:$8 sps:$4 sm:$0xff]  }
 0x215   : > { %v1051_v4 = vmax.f32 %v967_v62, 0.0  ;;  %2289 = vmatprep.subr.bf16.mxu1 %v3146_v58  ;;  %v3168_v56 = vld [vmem:[#allocation10 + $0x90] ss:$8 sps:$4 sm:$0xff]  }
 0x216   : > { %v1052_v6 = vmax.f32 %v969_v1, 0.0 }
 0x217   : > { %v1122_v7 = vpack.c.bf16 %v1051_v4, %v1049_v3 }
 0x218   : > { %v1123_v8 = vpack.c.bf16 %v1052_v6, %v1050_v5  ;;  %v972_v9 = vpop.f32.mrb[52].mxu0  ;;  %2290 = vmatpush1.bf16.msra.mxu1 %v3144_v57 }
 0x219   : > { %v973_v10 = vadd.f32 %v972_v9, %v3751_v43  ;;  %v974_v11 = vpop.f32.mrb[53].mxu0  ;;  %2291 = vmatprep.subr.bf16.mxu1 %v3149_v59 }
 0x21a   : > { %v975_v12 = vadd.f32 %v974_v11, %v3754_v44  ;;  %v976_v13 = vpop.f32.mrb[54].mxu0  ;;  %1453 = vmatprep.mubr.bf16.mxu1 %v1123_v8  ;;  %v3155_v8 = vld [vmem:[#allocation10 + $0x44] ss:$8 sps:$4 sm:$0xff]  }
 0x21b   : > { %v977_v14 = vadd.f32 %v976_v13, %v3751_v43  ;;  %v978_v15 = vpop.f32.mrb[55].mxu0  ;;  %1454 = vmatmul.mubr.bf16.gmra.mrb[48].mxu1 %v1122_v7  ;;  %v1053_v17 = vmax.f32 %v973_v10, 0.0  ;;  %v3153_v7 = vld [vmem:[#allocation10 + $0x40] ss:$8 sps:$4 sm:$0xff]   ;;  %v3158_v10 = vld [vmem:[#allocation10 + $0x54] ss:$8 sps:$4 sm:$0xff]  }
 0x21c   : > { %v979_v16 = vadd.f32 %v978_v15, %v3754_v44  ;;  %v1054_v19 = vmax.f32 %v975_v12, 0.0 }
 0x21d   : > { %v1055_v18 = vmax.f32 %v977_v14, 0.0 }
 0x21e   : > { %v1056_v20 = vmax.f32 %v979_v16, 0.0  ;;  %v3156_v16 = vld [vmem:[#allocation10 + $0x50] ss:$8 sps:$4 sm:$0xff]  }
 0x21f   : > { %v1124_v21 = vpack.c.bf16 %v1055_v18, %v1053_v17 }
 0x220   : > { %v1125_v22 = vpack.c.bf16 %v1056_v20, %v1054_v19  ;;  %v982_v23 = vpop.f32.mrb[56].mxu0  ;;  %v3161_v19 = vld [vmem:[#allocation10 + $0x64] ss:$8 sps:$4 sm:$0xff]  }
 0x221   : > { %v983_v24 = vadd.f32 %v982_v23, %v3751_v43  ;;  %v984_v25 = vpop.f32.mrb[57].mxu0 }
 0x222   : > { %v985_v26 = vadd.f32 %v984_v25, %v3754_v44  ;;  %v986_v27 = vpop.f32.mrb[58].mxu0  ;;  %1463 = vmatprep.mubr.bf16.mxu1 %v1125_v22 }
 0x223   : > { %v987_v28 = vadd.f32 %v986_v27, %v3751_v43  ;;  %v988_v29 = vpop.f32.mrb[59].mxu0  ;;  %1464 = vmatmul.mubr.bf16.gmra.mrb[52].mxu1 %v1124_v21  ;;  %v1057_v31 = vmax.f32 %v983_v24, 0.0 }
 0x224   : > { %v989_v30 = vadd.f32 %v988_v29, %v3754_v44  ;;  %v1058_v33 = vmax.f32 %v985_v26, 0.0  ;;  %v3159_v26 = vld [vmem:[#allocation10 + $0x60] ss:$8 sps:$4 sm:$0xff]  }
 0x225   : > { %v1059_v32 = vmax.f32 %v987_v28, 0.0  ;;  %v3164_v28 = vld [vmem:[#allocation10 + $0x74] ss:$8 sps:$4 sm:$0xff]  }
 0x226   : > { %v1060_v34 = vmax.f32 %v989_v30, 0.0 }
 0x227   : > { %v1126_v35 = vpack.c.bf16 %v1059_v32, %v1057_v31 }
 0x228   : > { %v1127_v36 = vpack.c.bf16 %v1060_v34, %v1058_v33  ;;  %v992_v37 = vpop.f32.mrb[60].mxu0  ;;  %v3162_v34 = vld [vmem:[#allocation10 + $0x70] ss:$8 sps:$4 sm:$0xff]  }
 0x229   : > { %v993_v39 = vadd.f32 %v992_v37, %v3751_v43  ;;  %v994_v41 = vpop.f32.mrb[61].mxu0  ;;  %v3167_v37 = vld [vmem:[#allocation10 + $0x84] ss:$8 sps:$4 sm:$0xff]  }
 0x22a   : > { %v995_v42 = vadd.f32 %v994_v41, %v3754_v44  ;;  %v996_v45 = vpop.f32.mrb[62].mxu0  ;;  %1473 = vmatprep.mubr.bf16.mxu1 %v1127_v36 }
 0x22b   : > { %v997_v46 = vadd.f32 %v996_v45, %v3751_v43  ;;  %v998_v47 = vpop.f32.mrb[63].mxu0  ;;  %1474 = vmatmul.mubr.bf16.gmra.mrb[56].mxu1 %v1126_v35  ;;  %v1061_v49 = vmax.f32 %v993_v39, 0.0  ;;  %v1097_v43 = vld [vmem:[%s4161_s4] sm:$0x3] }
 0x22c   : > { %v999_v48 = vadd.f32 %v998_v47, %v3754_v44  ;;  %v1062_v51 = vmax.f32 %v995_v42, 0.0  ;;  %v3147_v44 = vld [vmem:[#allocation10 + $0x20] ss:$8 sps:$4 sm:$0xff]   ;;  %v3824_v60 = vrot.slane %v1097_v43, %v3743_v38  ;;  %v3827_v61 = vrot.slane %v1097_v43, %v3748_v40  ;;  %v3173_v43 = vld [vmem:[#allocation10 + $0xa4] ss:$8 sps:$4 sm:$0xff]  }
 0x22d   : > { %v1063_v50 = vmax.f32 %v997_v46, 0.0  ;;  %2292 = vmatpush1.bf16.msra.mxu1 %v3147_v44 }
 0x22e   : > { %v1064_v52 = vmax.f32 %v999_v48, 0.0  ;;  %2293 = vmatprep.subr.bf16.mxu1 %v3152_v0  ;;  %v3165_v48 = vld [vmem:[#allocation10 + $0x80] ss:$8 sps:$4 sm:$0xff]  }
 0x22f   : > { %v1128_v53 = vpack.c.bf16 %v1063_v50, %v1061_v49  ;;  %v3170_v50 = vld [vmem:[#allocation10 + $0x94] ss:$8 sps:$4 sm:$0xff]  }
 0x230   : > { %v1129_v54 = vpack.c.bf16 %v1064_v52, %v1062_v51 }
 0x231   : > { %2294 = vmatpush1.bf16.msra.mxu1 %v3150_v63 }
 0x232   : > { %1483 = vmatprep.mubr.bf16.mxu1 %v1129_v54  ;;  %2295 = vmatprep.subr.bf16.mxu1 %v3155_v8 }
 0x233   : > { %1484 = vmatmul.mubr.bf16.gmra.mrb[60].mxu1 %v1128_v53 }
 0x235   : > { %2296 = vmatpush1.bf16.msra.mxu1 %v3153_v7 }
 0x236   : > { %2297 = vmatprep.subr.bf16.mxu1 %v3158_v10  ;;  %v3174_v10 = vld [vmem:[#allocation10 + $0xb0] ss:$8 sps:$4 sm:$0xff]  }
 0x239   : > { %2298 = vmatpush1.bf16.msra.mxu1 %v3156_v16 }
 0x23a   : > { %2299 = vmatprep.subr.bf16.mxu1 %v3161_v19 }
 0x23d   : > { %2300 = vmatpush1.bf16.msra.mxu1 %v3159_v26 }
 0x23e   : > { %2301 = vmatprep.subr.bf16.mxu1 %v3164_v28  ;;  %v3180_v28 = vld [vmem:[#allocation10 + $0xd0] ss:$8 sps:$4 sm:$0xff]  }
 0x241   : > { %2302 = vmatpush1.bf16.msra.mxu1 %v3162_v34 }
 0x242   : > { %2303 = vmatprep.subr.bf16.mxu1 %v3167_v37 }
 0x245   : > { %2304 = vmatpush1.bf16.msra.mxu1 %v3165_v48 }
 0x246   : > { %2305 = vmatprep.subr.bf16.mxu1 %v3170_v50 }
 0x249   : > { %2306 = vmatpush1.bf16.msra.mxu1 %v3168_v56 }
 0x24a   : > { %2307 = vmatprep.subr.bf16.mxu1 %v3173_v43 }
 0x28e   : > { %v1335_v62 = vpop.f32.mrb[0].mxu1 }
 0x28f   : > { %v1336_v1 = vadd.f32 %v1335_v62, %v3824_v60  ;;  %v1337_v2 = vpop.f32.mrb[1].mxu1 }
 0x290   : > { %v1338_v3 = vadd.f32 %v1337_v2, %v3827_v61  ;;  %v1339_v4 = vpop.f32.mrb[2].mxu1  ;;  %v3171_v2 = vld [vmem:[#allocation10 + $0xa0] ss:$8 sps:$4 sm:$0xff]  }
 0x291   : > { %v1340_v5 = vadd.f32 %v1339_v4, %v3824_v60  ;;  %v1341_v6 = vpop.f32.mrb[3].mxu1  ;;  %v1494_v11 = vmax.f32 %v1336_v1, 0.0  ;;  %v3176_v4 = vld [vmem:[#allocation10 + $0xb4] ss:$8 sps:$4 sm:$0xff]   ;;  %2308 = vmatpush1.bf16.msra.mxu1 %v3171_v2 }
 0x292   : > { %v1342_v9 = vadd.f32 %v1341_v6, %v3827_v61  ;;  %v1495_v13 = vmax.f32 %v1338_v3, 0.0  ;;  %2309 = vmatprep.subr.bf16.mxu1 %v3176_v4 }
 0x293   : > { %v1496_v12 = vmax.f32 %v1340_v5, 0.0 }
 0x294   : > { %v1497_v14 = vmax.f32 %v1342_v9, 0.0 }
 0x295   : > { %v1591_v15 = vpack.c.bf16 %v1496_v12, %v1494_v11  ;;  %2310 = vmatpush1.bf16.msra.mxu1 %v3174_v10 }
 0x296   : > { %v1592_v17 = vpack.c.bf16 %v1497_v14, %v1495_v13  ;;  %v1345_v18 = vpop.f32.mrb[4].mxu1  ;;  %v3179_v13 = vld [vmem:[#allocation10 + $0xc4] ss:$8 sps:$4 sm:$0xff]  }
 0x297   : > { %v1346_v20 = vadd.f32 %v1345_v18, %v3824_v60  ;;  %v1347_v21 = vpop.f32.mrb[5].mxu1  ;;  %2311 = vmatprep.subr.bf16.mxu1 %v3179_v13 }
 0x298   : > { %v1348_v22 = vadd.f32 %v1347_v21, %v3827_v61  ;;  %v1349_v23 = vpop.f32.mrb[6].mxu1  ;;  %1826 = vmatprep.mubr.bf16.mxu0 %v1592_v17 }
 0x299   : > { %v1350_v24 = vadd.f32 %v1349_v23, %v3824_v60  ;;  %v1351_v25 = vpop.f32.mrb[7].mxu1  ;;  %1827 = vmatmul.mubr.bf16.vlgmr.msra.gmra.mrb[64].mxu0 %v1591_v15  ;;  %v1498_v29 = vmax.f32 %v1346_v20, 0.0  ;;  %v3177_v20 = vld [vmem:[#allocation10 + $0xc0] ss:$8 sps:$4 sm:$0xff]  }
 0x29a   : > { %v1352_v27 = vadd.f32 %v1351_v25, %v3827_v61  ;;  %v1499_v31 = vmax.f32 %v1348_v22, 0.0  ;;  %v3182_v22 = vld [vmem:[#allocation10 + $0xd4] ss:$8 sps:$4 sm:$0xff]   ;;  %2312 = vmatpush1.bf16.msra.mxu1 %v3177_v20 }
 0x29b   : > { %v1500_v30 = vmax.f32 %v1350_v24, 0.0  ;;  %2313 = vmatprep.subr.bf16.mxu1 %v3182_v22 }
 0x29c   : > { %v1501_v32 = vmax.f32 %v1352_v27, 0.0 }
 0x29d   : > { %v1593_v33 = vpack.c.bf16 %v1500_v30, %v1498_v29 }
 0x29e   : > { %v1594_v35 = vpack.c.bf16 %v1501_v32, %v1499_v31  ;;  %v1355_v36 = vpop.f32.mrb[8].mxu1  ;;  %v3185_v31 = vld [vmem:[#allocation10 + $0xe4] ss:$8 sps:$4 sm:$0xff]   ;;  %2314 = vmatpush1.bf16.msra.mxu1 %v3180_v28 }
 0x29f   : > { %v1356_v39 = vadd.f32 %v1355_v36, %v3824_v60  ;;  %v1357_v41 = vpop.f32.mrb[9].mxu1  ;;  %2315 = vmatprep.subr.bf16.mxu1 %v3185_v31 }
 0x2a0   : > { %v1358_v42 = vadd.f32 %v1357_v41, %v3827_v61  ;;  %v1359_v45 = vpop.f32.mrb[10].mxu1  ;;  %1836 = vmatprep.mubr.bf16.mxu0 %v1594_v35 }
 0x2a1   : > { %v1360_v46 = vadd.f32 %v1359_v45, %v3824_v60  ;;  %v1361_v47 = vpop.f32.mrb[11].mxu1  ;;  %1837 = vmatmul.mubr.bf16.gmra.mrb[68].mxu0 %v1593_v33  ;;  %v1502_v51 = vmax.f32 %v1356_v39, 0.0  ;;  %v3183_v39 = vld [vmem:[#allocation10 + $0xe0] ss:$8 sps:$4 sm:$0xff]  }
 0x2a2   : > { %v1362_v49 = vadd.f32 %v1361_v47, %v3827_v61  ;;  %v1503_v53 = vmax.f32 %v1358_v42, 0.0  ;;  %2316 = vmatpush1.bf16.msra.mxu1 %v3183_v39 }
 0x2a3   : > { %v1504_v52 = vmax.f32 %v1360_v46, 0.0 }
 0x2a4   : > { %v1505_v54 = vmax.f32 %v1362_v49, 0.0 }
 0x2a5   : > { %v1595_v55 = vpack.c.bf16 %v1504_v52, %v1502_v51 }
 0x2a6   : > { %v1596_v57 = vpack.c.bf16 %v1505_v54, %v1503_v53  ;;  %v1365_v58 = vpop.f32.mrb[12].mxu1 }
 0x2a7   : > { %v1366_v44 = vadd.f32 %v1365_v58, %v3824_v60  ;;  %v1367_v59 = vpop.f32.mrb[13].mxu1 }
 0x2a8   : > { %v1368_v62 = vadd.f32 %v1367_v59, %v3827_v61  ;;  %v1369_v63 = vpop.f32.mrb[14].mxu1  ;;  %1846 = vmatprep.mubr.bf16.mxu0 %v1596_v57 }
 0x2a9   : > { %v1370_v0 = vadd.f32 %v1369_v63, %v3824_v60  ;;  %v1371_v1 = vpop.f32.mrb[15].mxu1  ;;  %1847 = vmatmul.mubr.bf16.gmra.mrb[72].mxu0 %v1595_v55  ;;  %v1506_v5 = vmax.f32 %v1366_v44, 0.0 }
 0x2aa   : > { %v1372_v3 = vadd.f32 %v1371_v1, %v3827_v61  ;;  %v1507_v7 = vmax.f32 %v1368_v62, 0.0 }
 0x2ab   : > { %v1508_v6 = vmax.f32 %v1370_v0, 0.0 }
 0x2ac   : > { %v1509_v8 = vmax.f32 %v1372_v3, 0.0 }
 0x2ad   : > { %v1597_v9 = vpack.c.bf16 %v1508_v6, %v1506_v5 }
 0x2ae   : > { %v1598_v11 = vpack.c.bf16 %v1509_v8, %v1507_v7  ;;  %v1375_v12 = vpop.f32.mrb[16].mxu1 }
 0x2af   : > { %v1376_v14 = vadd.f32 %v1375_v12, %v3824_v60  ;;  %v1377_v15 = vpop.f32.mrb[17].mxu1 }
 0x2b0   : > { %v1378_v16 = vadd.f32 %v1377_v15, %v3827_v61  ;;  %v1379_v17 = vpop.f32.mrb[18].mxu1  ;;  %1856 = vmatprep.mubr.bf16.mxu0 %v1598_v11 }
 0x2b1   : > { %v1380_v18 = vadd.f32 %v1379_v17, %v3824_v60  ;;  %v1381_v19 = vpop.f32.mrb[19].mxu1  ;;  %1857 = vmatmul.mubr.bf16.gmra.mrb[76].mxu0 %v1597_v9  ;;  %v1510_v23 = vmax.f32 %v1376_v14, 0.0 }
 0x2b2   : > { %v1382_v21 = vadd.f32 %v1381_v19, %v3827_v61  ;;  %v1511_v25 = vmax.f32 %v1378_v16, 0.0 }
 0x2b3   : > { %v1512_v24 = vmax.f32 %v1380_v18, 0.0 }
 0x2b4   : > { %v1513_v26 = vmax.f32 %v1382_v21, 0.0 }
 0x2b5   : > { %v1599_v27 = vpack.c.bf16 %v1512_v24, %v1510_v23 }
 0x2b6   : > { %v1600_v29 = vpack.c.bf16 %v1513_v26, %v1511_v25  ;;  %v1385_v30 = vpop.f32.mrb[20].mxu1 }
 0x2b7   : > { %v1386_v32 = vadd.f32 %v1385_v30, %v3824_v60  ;;  %v1387_v33 = vpop.f32.mrb[21].mxu1 }
 0x2b8   : > { %v1388_v34 = vadd.f32 %v1387_v33, %v3827_v61  ;;  %v1389_v35 = vpop.f32.mrb[22].mxu1  ;;  %1866 = vmatprep.mubr.bf16.mxu0 %v1600_v29 }
 0x2b9   : > { %v1390_v36 = vadd.f32 %v1389_v35, %v3824_v60  ;;  %v1391_v37 = vpop.f32.mrb[23].mxu1  ;;  %1867 = vmatmul.mubr.bf16.gmra.mrb[80].mxu0 %v1599_v27  ;;  %v1514_v42 = vmax.f32 %v1386_v32, 0.0 }
 0x2ba   : > { %v1392_v41 = vadd.f32 %v1391_v37, %v3827_v61  ;;  %v1515_v46 = vmax.f32 %v1388_v34, 0.0 }
 0x2bb   : > { %v1516_v45 = vmax.f32 %v1390_v36, 0.0 }
 0x2bc   : > { %v1517_v47 = vmax.f32 %v1392_v41, 0.0 }
 0x2bd   : > { %v1601_v48 = vpack.c.bf16 %v1516_v45, %v1514_v42 }
 0x2be   : > { %v1602_v49 = vpack.c.bf16 %v1517_v47, %v1515_v46  ;;  %v1395_v50 = vpop.f32.mrb[24].mxu1 }
 0x2bf   : > { %v1396_v51 = vadd.f32 %v1395_v50, %v3824_v60  ;;  %v1397_v52 = vpop.f32.mrb[25].mxu1 }
 0x2c0   : > { %v1398_v53 = vadd.f32 %v1397_v52, %v3827_v61  ;;  %v1399_v54 = vpop.f32.mrb[26].mxu1  ;;  %1876 = vmatprep.mubr.bf16.mxu0 %v1602_v49 }
 0x2c1   : > { %v1400_v55 = vadd.f32 %v1399_v54, %v3824_v60  ;;  %v1401_v56 = vpop.f32.mrb[27].mxu1  ;;  %1877 = vmatmul.mubr.bf16.gmra.mrb[84].mxu0 %v1601_v48  ;;  %v1518_v58 = vmax.f32 %v1396_v51, 0.0 }
 0x2c2   : > { %v1402_v57 = vadd.f32 %v1401_v56, %v3827_v61  ;;  %v1519_v44 = vmax.f32 %v1398_v53, 0.0 }
 0x2c3   : > { %v1520_v43 = vmax.f32 %v1400_v55, 0.0 }
 0x2c4   : > { %v1521_v59 = vmax.f32 %v1402_v57, 0.0 }
 0x2c5   : > { %v1603_v62 = vpack.c.bf16 %v1520_v43, %v1518_v58 }
 0x2c6   : > { %v1604_v63 = vpack.c.bf16 %v1521_v59, %v1519_v44  ;;  %v1405_v0 = vpop.f32.mrb[28].mxu1 }
 0x2c7   : > { %v1406_v1 = vadd.f32 %v1405_v0, %v3824_v60  ;;  %v1407_v2 = vpop.f32.mrb[29].mxu1 }
 0x2c8   : > { %v1408_v3 = vadd.f32 %v1407_v2, %v3827_v61  ;;  %v1409_v4 = vpop.f32.mrb[30].mxu1  ;;  %1886 = vmatprep.mubr.bf16.mxu0 %v1604_v63 }
 0x2c9   : > { %v1410_v5 = vadd.f32 %v1409_v4, %v3824_v60  ;;  %v1411_v6 = vpop.f32.mrb[31].mxu1  ;;  %1887 = vmatmul.mubr.bf16.gmra.mrb[88].mxu0 %v1603_v62  ;;  %v1522_v8 = vmax.f32 %v1406_v1, 0.0 }
 0x2ca   : > { %v1412_v7 = vadd.f32 %v1411_v6, %v3827_v61  ;;  %v1523_v10 = vmax.f32 %v1408_v3, 0.0 }
 0x2cb   : > { %v1524_v9 = vmax.f32 %v1410_v5, 0.0 }
 0x2cc   : > { %v1525_v11 = vmax.f32 %v1412_v7, 0.0 }
 0x2cd   : > { %v1605_v12 = vpack.c.bf16 %v1524_v9, %v1522_v8 }
 0x2ce   : > { %v1606_v13 = vpack.c.bf16 %v1525_v11, %v1523_v10  ;;  %v1415_v14 = vpop.f32.mrb[32].mxu1 }
 0x2cf   : > { %v1416_v15 = vadd.f32 %v1415_v14, %v3824_v60  ;;  %v1417_v16 = vpop.f32.mrb[33].mxu1 }
 0x2d0   : > { %v1418_v17 = vadd.f32 %v1417_v16, %v3827_v61  ;;  %v1419_v18 = vpop.f32.mrb[34].mxu1  ;;  %1896 = vmatprep.mubr.bf16.mxu0 %v1606_v13 }
 0x2d1   : > { %v1420_v19 = vadd.f32 %v1419_v18, %v3824_v60  ;;  %v1421_v20 = vpop.f32.mrb[35].mxu1  ;;  %1897 = vmatmul.mubr.bf16.gmra.mrb[92].mxu0 %v1605_v12  ;;  %v1526_v22 = vmax.f32 %v1416_v15, 0.0 }
 0x2d2   : > { %v1422_v21 = vadd.f32 %v1421_v20, %v3827_v61  ;;  %v1527_v24 = vmax.f32 %v1418_v17, 0.0  ;;  %v3188_v17 = vld [vmem:[#allocation10 + $0xf4] ss:$8 sps:$4 sm:$0xff]  }
 0x2d3   : > { %v1528_v23 = vmax.f32 %v1420_v19, 0.0  ;;  %v3186_v19 = vld [vmem:[#allocation10 + $0xf0] ss:$8 sps:$4 sm:$0xff]   ;;  %2317 = vmatprep.subr.bf16.mxu1 %v3188_v17 }
 0x2d4   : > { %v1529_v25 = vmax.f32 %v1422_v21, 0.0  ;;  %2318 = vmatpush1.bf16.msra.mxu1 %v3186_v19 }
 0x2d5   : > { %v1607_v26 = vpack.c.bf16 %v1528_v23, %v1526_v22 }
 0x2d6   : > { %v1608_v27 = vpack.c.bf16 %v1529_v25, %v1527_v24  ;;  %v1425_v28 = vpop.f32.mrb[36].mxu1 }
 0x2d7   : > { %v1426_v29 = vadd.f32 %v1425_v28, %v3824_v60  ;;  %v1427_v30 = vpop.f32.mrb[37].mxu1 }
 0x2d8   : > { %v1428_v31 = vadd.f32 %v1427_v30, %v3827_v61  ;;  %v1429_v32 = vpop.f32.mrb[38].mxu1  ;;  %1906 = vmatprep.mubr.bf16.mxu0 %v1608_v27 }
 0x2d9   : > { %v1430_v33 = vadd.f32 %v1429_v32, %v3824_v60  ;;  %v1431_v34 = vpop.f32.mrb[39].mxu1  ;;  %1907 = vmatmul.mubr.bf16.gmra.mrb[96].mxu0 %v1607_v26  ;;  %v1530_v36 = vmax.f32 %v1426_v29, 0.0 }
 0x2da   : > { %v1432_v35 = vadd.f32 %v1431_v34, %v3827_v61  ;;  %v1531_v39 = vmax.f32 %v1428_v31, 0.0 }
 0x2db   : > { %v1532_v37 = vmax.f32 %v1430_v33, 0.0 }
 0x2dc   : > { %v1533_v41 = vmax.f32 %v1432_v35, 0.0 }
 0x2dd   : > { %v1609_v42 = vpack.c.bf16 %v1532_v37, %v1530_v36 }
 0x2de   : > { %v1610_v45 = vpack.c.bf16 %v1533_v41, %v1531_v39  ;;  %v1435_v46 = vpop.f32.mrb[40].mxu1 }
 0x2df   : > { %v1436_v47 = vadd.f32 %v1435_v46, %v3824_v60  ;;  %v1437_v48 = vpop.f32.mrb[41].mxu1 }
 0x2e0   : > { %v1438_v49 = vadd.f32 %v1437_v48, %v3827_v61  ;;  %v1439_v50 = vpop.f32.mrb[42].mxu1  ;;  %1916 = vmatprep.mubr.bf16.mxu0 %v1610_v45 }
 0x2e1   : > { %v1440_v51 = vadd.f32 %v1439_v50, %v3824_v60  ;;  %v1441_v52 = vpop.f32.mrb[43].mxu1  ;;  %1917 = vmatmul.mubr.bf16.gmra.mrb[100].mxu0 %v1609_v42  ;;  %v1534_v54 = vmax.f32 %v1436_v47, 0.0 }
 0x2e2   : > { %v1442_v53 = vadd.f32 %v1441_v52, %v3827_v61  ;;  %v1535_v56 = vmax.f32 %v1438_v49, 0.0 }
 0x2e3   : > { %v1536_v55 = vmax.f32 %v1440_v51, 0.0 }
 0x2e4   : > { %v1537_v57 = vmax.f32 %v1442_v53, 0.0 }
 0x2e5   : > { %v1611_v58 = vpack.c.bf16 %v1536_v55, %v1534_v54 }
 0x2e6   : > { %v1612_v43 = vpack.c.bf16 %v1537_v57, %v1535_v56  ;;  %v1445_v44 = vpop.f32.mrb[44].mxu1 }
 0x2e7   : > { %v1446_v59 = vadd.f32 %v1445_v44, %v3824_v60  ;;  %v1447_v62 = vpop.f32.mrb[45].mxu1 }
 0x2e8   : > { %v1448_v63 = vadd.f32 %v1447_v62, %v3827_v61  ;;  %v1449_v0 = vpop.f32.mrb[46].mxu1  ;;  %1926 = vmatprep.mubr.bf16.mxu0 %v1612_v43 }
 0x2e9   : > { %v1450_v1 = vadd.f32 %v1449_v0, %v3824_v60  ;;  %v1451_v2 = vpop.f32.mrb[47].mxu1  ;;  %1927 = vmatmul.mubr.bf16.gmra.mrb[104].mxu0 %v1611_v58  ;;  %v1538_v4 = vmax.f32 %v1446_v59, 0.0 }
 0x2ea   : > { %v1452_v3 = vadd.f32 %v1451_v2, %v3827_v61  ;;  %v1539_v6 = vmax.f32 %v1448_v63, 0.0 }
 0x2eb   : > { %v1540_v5 = vmax.f32 %v1450_v1, 0.0 }
 0x2ec   : > { %v1541_v7 = vmax.f32 %v1452_v3, 0.0 }
 0x2ed   : > { %v1613_v8 = vpack.c.bf16 %v1540_v5, %v1538_v4 }
 0x2ee   : > { %v1614_v9 = vpack.c.bf16 %v1541_v7, %v1539_v6  ;;  %v1455_v10 = vpop.f32.mrb[48].mxu1 }
 0x2ef   : > { %v1456_v11 = vadd.f32 %v1455_v10, %v3824_v60  ;;  %v1457_v12 = vpop.f32.mrb[49].mxu1 }
 0x2f0   : > { %v1458_v13 = vadd.f32 %v1457_v12, %v3827_v61  ;;  %v1459_v14 = vpop.f32.mrb[50].mxu1  ;;  %1936 = vmatprep.mubr.bf16.mxu0 %v1614_v9 }
 0x2f1   : > { %v1460_v15 = vadd.f32 %v1459_v14, %v3824_v60  ;;  %v1461_v16 = vpop.f32.mrb[51].mxu1  ;;  %1937 = vmatmul.mubr.bf16.gmra.mrb[108].mxu0 %v1613_v8  ;;  %v1542_v20 = vmax.f32 %v1456_v11, 0.0  ;;  %v1590_v8 = vld [vmem:[%s4163_s6] sm:$0x3] }
 0x2f2   : > { %v1462_v18 = vadd.f32 %v1461_v16, %v3827_v61  ;;  %v1543_v22 = vmax.f32 %v1458_v13, 0.0  ;;  %v3897_v9 = vrot.slane %v1590_v8, %v3743_v38 }
 0x2f3   : > { %v1544_v21 = vmax.f32 %v1460_v15, 0.0 }
 0x2f4   : > { %v1545_v23 = vmax.f32 %v1462_v18, 0.0 }
 0x2f5   : > { %v1615_v24 = vpack.c.bf16 %v1544_v21, %v1542_v20 }
 0x2f6   : > { %v1616_v25 = vpack.c.bf16 %v1545_v23, %v1543_v22  ;;  %v1465_v26 = vpop.f32.mrb[52].mxu1 }
 0x2f7   : > { %v1466_v27 = vadd.f32 %v1465_v26, %v3824_v60  ;;  %v1467_v28 = vpop.f32.mrb[53].mxu1 }
 0x2f8   : > { %v1468_v29 = vadd.f32 %v1467_v28, %v3827_v61  ;;  %v1469_v30 = vpop.f32.mrb[54].mxu1  ;;  %1946 = vmatprep.mubr.bf16.mxu0 %v1616_v25 }
 0x2f9   : > { %v1470_v31 = vadd.f32 %v1469_v30, %v3824_v60  ;;  %v1471_v32 = vpop.f32.mrb[55].mxu1  ;;  %1947 = vmatmul.mubr.bf16.gmra.mrb[112].mxu0 %v1615_v24  ;;  %v1546_v34 = vmax.f32 %v1466_v27, 0.0 }
 0x2fa   : > { %v1472_v33 = vadd.f32 %v1471_v32, %v3827_v61  ;;  %v1547_v36 = vmax.f32 %v1468_v29, 0.0 }
 0x2fb   : > { %v1548_v35 = vmax.f32 %v1470_v31, 0.0 }
 0x2fc   : > { %v1549_v37 = vmax.f32 %v1472_v33, 0.0 }
 0x2fd   : > { %v1617_v39 = vpack.c.bf16 %v1548_v35, %v1546_v34 }
 0x2fe   : > { %v1618_v41 = vpack.c.bf16 %v1549_v37, %v1547_v36  ;;  %v1475_v42 = vpop.f32.mrb[56].mxu1 }
 0x2ff   : > { %v1476_v45 = vadd.f32 %v1475_v42, %v3824_v60  ;;  %v1477_v46 = vpop.f32.mrb[57].mxu1 }
 0x300   : > { %v1478_v47 = vadd.f32 %v1477_v46, %v3827_v61  ;;  %v1479_v48 = vpop.f32.mrb[58].mxu1  ;;  %1956 = vmatprep.mubr.bf16.mxu0 %v1618_v41 }
 0x301   : > { %v1480_v49 = vadd.f32 %v1479_v48, %v3824_v60  ;;  %v1481_v50 = vpop.f32.mrb[59].mxu1  ;;  %1957 = vmatmul.mubr.bf16.gmra.mrb[116].mxu0 %v1617_v39  ;;  %v1550_v52 = vmax.f32 %v1476_v45, 0.0 }
 0x302   : > { %v1482_v51 = vadd.f32 %v1481_v50, %v3827_v61  ;;  %v1551_v54 = vmax.f32 %v1478_v47, 0.0 }
 0x303   : > { %v1552_v53 = vmax.f32 %v1480_v49, 0.0 }
 0x304   : > { %v1553_v55 = vmax.f32 %v1482_v51, 0.0 }
 0x305   : > { %v1619_v56 = vpack.c.bf16 %v1552_v53, %v1550_v52 }
 0x306   : > { %v1620_v57 = vpack.c.bf16 %v1553_v55, %v1551_v54  ;;  %v1485_v58 = vpop.f32.mrb[60].mxu1 }
 0x307   : > { %v1486_v43 = vadd.f32 %v1485_v58, %v3824_v60  ;;  %v1487_v44 = vpop.f32.mrb[61].mxu1 }
 0x308   : > { %v1488_v59 = vadd.f32 %v1487_v44, %v3827_v61  ;;  %v1489_v62 = vpop.f32.mrb[62].mxu1  ;;  %1966 = vmatprep.mubr.bf16.mxu0 %v1620_v57 }
 0x309   : > { %v1490_v63 = vadd.f32 %v1489_v62, %v3824_v60  ;;  %v1491_v0 = vpop.f32.mrb[63].mxu1  ;;  %1967 = vmatmul.mubr.bf16.gmra.mrb[120].mxu0 %v1619_v56  ;;  %v1554_v2 = vmax.f32 %v1486_v43, 0.0  ;;  %v3900_v60 = vrot.slane %v1590_v8, %v3748_v40 }
 0x30a   : > { %v1492_v1 = vadd.f32 %v1491_v0, %v3827_v61  ;;  %v1555_v4 = vmax.f32 %v1488_v59, 0.0 }
 0x30b   : > { %v1556_v3 = vmax.f32 %v1490_v63, 0.0 }
 0x30c   : > { %v1557_v5 = vmax.f32 %v1492_v1, 0.0 }
 0x30d   : > { %v1621_v6 = vpack.c.bf16 %v1556_v3, %v1554_v2 }
 0x30e   : > { %v1622_v7 = vpack.c.bf16 %v1557_v5, %v1555_v4 }
 0x310   : > { %1976 = vmatprep.mubr.bf16.mxu0 %v1622_v7 }
 0x311   : > { %1977 = vmatmul.mubr.bf16.gmra.mrb[124].mxu0 %v1621_v6 }
 0x36c   : > { %v1828_v10 = vpop.f32.mrb[64].mxu0 }
 0x36d   : > { %v1829_v61 = vadd.f32 %v1828_v10, %v3897_v9  ;;  %v1830_v11 = vpop.f32.mrb[65].mxu0 }
 0x36e   : > { %v1831_v12 = vadd.f32 %v1830_v11, %v3900_v60  ;;  %v1832_v13 = vpop.f32.mrb[66].mxu0 }
 0x36f   : > { %v1833_v14 = vadd.f32 %v1832_v13, %v3897_v9  ;;  %v1834_v15 = vpop.f32.mrb[67].mxu0  ;;  %v1987_v17 = vmax.f32 %v1829_v61, 0.0 }
 0x370   : > { %v1835_v16 = vadd.f32 %v1834_v15, %v3900_v60  ;;  %v1988_v19 = vmax.f32 %v1831_v12, 0.0 }
 0x371   : > { %v1989_v18 = vmax.f32 %v1833_v14, 0.0 }
 0x372   : > { %v1990_v20 = vmax.f32 %v1835_v16, 0.0 }
 0x373   : > { %v2084_v21 = vpack.c.bf16 %v1989_v18, %v1987_v17 }
 0x374   : > { %v2085_v22 = vpack.c.bf16 %v1990_v20, %v1988_v19  ;;  %v1838_v23 = vpop.f32.mrb[68].mxu0 }
 0x375   : > { %v1839_v24 = vadd.f32 %v1838_v23, %v3897_v9  ;;  %v1840_v25 = vpop.f32.mrb[69].mxu0 }
 0x376   : > { %v1841_v26 = vadd.f32 %v1840_v25, %v3900_v60  ;;  %v1842_v27 = vpop.f32.mrb[70].mxu0  ;;  %2319 = vmatprep.mubr.bf16.mxu1 %v2085_v22 }
 0x377   : > { %v1843_v28 = vadd.f32 %v1842_v27, %v3897_v9  ;;  %v1844_v29 = vpop.f32.mrb[71].mxu0  ;;  %2320 = vmatmul.mubr.bf16.vlgmr.msra.gmra.mrb[64].mxu1 %v2084_v21  ;;  %v1991_v31 = vmax.f32 %v1839_v24, 0.0 }
 0x378   : > { %v1845_v30 = vadd.f32 %v1844_v29, %v3900_v60  ;;  %v1992_v33 = vmax.f32 %v1841_v26, 0.0 }
 0x379   : > { %v1993_v32 = vmax.f32 %v1843_v28, 0.0 }
 0x37a   : > { %v1994_v34 = vmax.f32 %v1845_v30, 0.0 }
 0x37b   : > { %v2086_v35 = vpack.c.bf16 %v1993_v32, %v1991_v31 }
 0x37c   : > { %v2087_v36 = vpack.c.bf16 %v1994_v34, %v1992_v33  ;;  %v1848_v37 = vpop.f32.mrb[72].mxu0 }
 0x37d   : > { %v1849_v39 = vadd.f32 %v1848_v37, %v3897_v9  ;;  %v1850_v41 = vpop.f32.mrb[73].mxu0 }
 0x37e   : > { %v1851_v42 = vadd.f32 %v1850_v41, %v3900_v60  ;;  %v1852_v45 = vpop.f32.mrb[74].mxu0  ;;  %2329 = vmatprep.mubr.bf16.mxu1 %v2087_v36 }
 0x37f   : > { %v1853_v46 = vadd.f32 %v1852_v45, %v3897_v9  ;;  %v1854_v47 = vpop.f32.mrb[75].mxu0  ;;  %2330 = vmatmul.mubr.bf16.gmra.mrb[68].mxu1 %v2086_v35  ;;  %v1995_v49 = vmax.f32 %v1849_v39, 0.0 }
 0x380   : > { %v1855_v48 = vadd.f32 %v1854_v47, %v3900_v60  ;;  %v1996_v51 = vmax.f32 %v1851_v42, 0.0 }
 0x381   : > { %v1997_v50 = vmax.f32 %v1853_v46, 0.0 }
 0x382   : > { %v1998_v52 = vmax.f32 %v1855_v48, 0.0 }
 0x383   : > { %v2088_v53 = vpack.c.bf16 %v1997_v50, %v1995_v49 }
 0x384   : > { %v2089_v54 = vpack.c.bf16 %v1998_v52, %v1996_v51  ;;  %v1858_v55 = vpop.f32.mrb[76].mxu0 }
 0x385   : > { %v1859_v56 = vadd.f32 %v1858_v55, %v3897_v9  ;;  %v1860_v57 = vpop.f32.mrb[77].mxu0 }
 0x386   : > { %v1861_v58 = vadd.f32 %v1860_v57, %v3900_v60  ;;  %v1862_v43 = vpop.f32.mrb[78].mxu0  ;;  %2339 = vmatprep.mubr.bf16.mxu1 %v2089_v54 }
 0x387   : > { %v1863_v44 = vadd.f32 %v1862_v43, %v3897_v9  ;;  %v1864_v59 = vpop.f32.mrb[79].mxu0  ;;  %2340 = vmatmul.mubr.bf16.gmra.mrb[72].mxu1 %v2088_v53  ;;  %v1999_v63 = vmax.f32 %v1859_v56, 0.0 }
 0x388   : > { %v1865_v62 = vadd.f32 %v1864_v59, %v3900_v60  ;;  %v2000_v1 = vmax.f32 %v1861_v58, 0.0 }
 0x389   : > { %v2001_v0 = vmax.f32 %v1863_v44, 0.0 }
 0x38a   : > { %v2002_v2 = vmax.f32 %v1865_v62, 0.0 }
 0x38b   : > { %v2090_v3 = vpack.c.bf16 %v2001_v0, %v1999_v63 }
 0x38c   : > { %v2091_v4 = vpack.c.bf16 %v2002_v2, %v2000_v1  ;;  %v1868_v5 = vpop.f32.mrb[80].mxu0 }
 0x38d   : > { %v1869_v6 = vadd.f32 %v1868_v5, %v3897_v9  ;;  %v1870_v7 = vpop.f32.mrb[81].mxu0 }
 0x38e   : > { %v1871_v8 = vadd.f32 %v1870_v7, %v3900_v60  ;;  %v1872_v10 = vpop.f32.mrb[82].mxu0  ;;  %2349 = vmatprep.mubr.bf16.mxu1 %v2091_v4 }
 0x38f   : > { %v1873_v61 = vadd.f32 %v1872_v10, %v3897_v9  ;;  %v1874_v11 = vpop.f32.mrb[83].mxu0  ;;  %2350 = vmatmul.mubr.bf16.gmra.mrb[76].mxu1 %v2090_v3  ;;  %v2003_v13 = vmax.f32 %v1869_v6, 0.0 }
 0x390   : > { %v1875_v12 = vadd.f32 %v1874_v11, %v3900_v60  ;;  %v2004_v15 = vmax.f32 %v1871_v8, 0.0 }
 0x391   : > { %v2005_v14 = vmax.f32 %v1873_v61, 0.0 }
 0x392   : > { %v2006_v16 = vmax.f32 %v1875_v12, 0.0 }
 0x393   : > { %v2092_v17 = vpack.c.bf16 %v2005_v14, %v2003_v13 }
 0x394   : > { %v2093_v18 = vpack.c.bf16 %v2006_v16, %v2004_v15  ;;  %v1878_v19 = vpop.f32.mrb[84].mxu0 }
 0x395   : > { %v1879_v20 = vadd.f32 %v1878_v19, %v3897_v9  ;;  %v1880_v21 = vpop.f32.mrb[85].mxu0 }
 0x396   : > { %v1881_v22 = vadd.f32 %v1880_v21, %v3900_v60  ;;  %v1882_v23 = vpop.f32.mrb[86].mxu0  ;;  %2359 = vmatprep.mubr.bf16.mxu1 %v2093_v18 }
 0x397   : > { %v1883_v24 = vadd.f32 %v1882_v23, %v3897_v9  ;;  %v1884_v25 = vpop.f32.mrb[87].mxu0  ;;  %2360 = vmatmul.mubr.bf16.gmra.mrb[80].mxu1 %v2092_v17  ;;  %v2007_v27 = vmax.f32 %v1879_v20, 0.0 }
 0x398   : > { %v1885_v26 = vadd.f32 %v1884_v25, %v3900_v60  ;;  %v2008_v29 = vmax.f32 %v1881_v22, 0.0 }
 0x399   : > { %v2009_v28 = vmax.f32 %v1883_v24, 0.0 }
 0x39a   : > { %v2010_v30 = vmax.f32 %v1885_v26, 0.0 }
 0x39b   : > { %v2094_v31 = vpack.c.bf16 %v2009_v28, %v2007_v27 }
 0x39c   : > { %v2095_v32 = vpack.c.bf16 %v2010_v30, %v2008_v29  ;;  %v1888_v33 = vpop.f32.mrb[88].mxu0 }
 0x39d   : > { %v1889_v34 = vadd.f32 %v1888_v33, %v3897_v9  ;;  %v1890_v35 = vpop.f32.mrb[89].mxu0 }
 0x39e   : > { %v1891_v36 = vadd.f32 %v1890_v35, %v3900_v60  ;;  %v1892_v37 = vpop.f32.mrb[90].mxu0  ;;  %2369 = vmatprep.mubr.bf16.mxu1 %v2095_v32 }
 0x39f   : > { %v1893_v39 = vadd.f32 %v1892_v37, %v3897_v9  ;;  %v1894_v41 = vpop.f32.mrb[91].mxu0  ;;  %2370 = vmatmul.mubr.bf16.gmra.mrb[84].mxu1 %v2094_v31  ;;  %v2011_v45 = vmax.f32 %v1889_v34, 0.0 }
 0x3a0   : > { %v1895_v42 = vadd.f32 %v1894_v41, %v3900_v60  ;;  %v2012_v47 = vmax.f32 %v1891_v36, 0.0 }
 0x3a1   : > { %v2013_v46 = vmax.f32 %v1893_v39, 0.0 }
 0x3a2   : > { %v2014_v48 = vmax.f32 %v1895_v42, 0.0 }
 0x3a3   : > { %v2096_v49 = vpack.c.bf16 %v2013_v46, %v2011_v45 }
 0x3a4   : > { %v2097_v50 = vpack.c.bf16 %v2014_v48, %v2012_v47  ;;  %v1898_v51 = vpop.f32.mrb[92].mxu0 }
 0x3a5   : > { %v1899_v52 = vadd.f32 %v1898_v51, %v3897_v9  ;;  %v1900_v53 = vpop.f32.mrb[93].mxu0 }
 0x3a6   : > { %v1901_v54 = vadd.f32 %v1900_v53, %v3900_v60  ;;  %v1902_v55 = vpop.f32.mrb[94].mxu0  ;;  %2379 = vmatprep.mubr.bf16.mxu1 %v2097_v50 }
 0x3a7   : > { %v1903_v56 = vadd.f32 %v1902_v55, %v3897_v9  ;;  %v1904_v57 = vpop.f32.mrb[95].mxu0  ;;  %2380 = vmatmul.mubr.bf16.gmra.mrb[88].mxu1 %v2096_v49  ;;  %v2015_v43 = vmax.f32 %v1899_v52, 0.0 }
 0x3a8   : > { %v1905_v58 = vadd.f32 %v1904_v57, %v3900_v60  ;;  %v2016_v59 = vmax.f32 %v1901_v54, 0.0 }
 0x3a9   : > { %v2017_v44 = vmax.f32 %v1903_v56, 0.0 }
 0x3aa   : > { %v2018_v62 = vmax.f32 %v1905_v58, 0.0 }
 0x3ab   : > { %v2098_v63 = vpack.c.bf16 %v2017_v44, %v2015_v43 }
 0x3ac   : > { %v2099_v0 = vpack.c.bf16 %v2018_v62, %v2016_v59  ;;  %v1908_v1 = vpop.f32.mrb[96].mxu0 }
 0x3ad   : > { %v1909_v2 = vadd.f32 %v1908_v1, %v3897_v9  ;;  %v1910_v3 = vpop.f32.mrb[97].mxu0 }
 0x3ae   : > { %v1911_v4 = vadd.f32 %v1910_v3, %v3900_v60  ;;  %v1912_v5 = vpop.f32.mrb[98].mxu0  ;;  %2389 = vmatprep.mubr.bf16.mxu1 %v2099_v0 }
 0x3af   : > { %v1913_v6 = vadd.f32 %v1912_v5, %v3897_v9  ;;  %v1914_v7 = vpop.f32.mrb[99].mxu0  ;;  %2390 = vmatmul.mubr.bf16.gmra.mrb[92].mxu1 %v2098_v63  ;;  %v2019_v10 = vmax.f32 %v1909_v2, 0.0 }
 0x3b0   : > { %v1915_v8 = vadd.f32 %v1914_v7, %v3900_v60  ;;  %v2020_v11 = vmax.f32 %v1911_v4, 0.0 }
 0x3b1   : > { %v2021_v61 = vmax.f32 %v1913_v6, 0.0 }
 0x3b2   : > { %v2022_v12 = vmax.f32 %v1915_v8, 0.0 }
 0x3b3   : > { %v2100_v13 = vpack.c.bf16 %v2021_v61, %v2019_v10 }
 0x3b4   : > { %v2101_v14 = vpack.c.bf16 %v2022_v12, %v2020_v11  ;;  %v1918_v15 = vpop.f32.mrb[100].mxu0 }
 0x3b5   : > { %v1919_v16 = vadd.f32 %v1918_v15, %v3897_v9  ;;  %v1920_v17 = vpop.f32.mrb[101].mxu0 }
 0x3b6   : > { %v1921_v18 = vadd.f32 %v1920_v17, %v3900_v60  ;;  %v1922_v19 = vpop.f32.mrb[102].mxu0  ;;  %2399 = vmatprep.mubr.bf16.mxu1 %v2101_v14 }
 0x3b7   : > { %v1923_v20 = vadd.f32 %v1922_v19, %v3897_v9  ;;  %v1924_v21 = vpop.f32.mrb[103].mxu0  ;;  %2400 = vmatmul.mubr.bf16.gmra.mrb[96].mxu1 %v2100_v13  ;;  %v2023_v23 = vmax.f32 %v1919_v16, 0.0 }
 0x3b8   : > { %v1925_v22 = vadd.f32 %v1924_v21, %v3900_v60  ;;  %v2024_v25 = vmax.f32 %v1921_v18, 0.0 }
 0x3b9   : > { %v2025_v24 = vmax.f32 %v1923_v20, 0.0 }
 0x3ba   : > { %v2026_v26 = vmax.f32 %v1925_v22, 0.0 }
 0x3bb   : > { %v2102_v27 = vpack.c.bf16 %v2025_v24, %v2023_v23 }
 0x3bc   : > { %v2103_v28 = vpack.c.bf16 %v2026_v26, %v2024_v25  ;;  %v1928_v29 = vpop.f32.mrb[104].mxu0 }
 0x3bd   : > { %v1929_v30 = vadd.f32 %v1928_v29, %v3897_v9  ;;  %v1930_v31 = vpop.f32.mrb[105].mxu0 }
 0x3be   : > { %v1931_v32 = vadd.f32 %v1930_v31, %v3900_v60  ;;  %v1932_v33 = vpop.f32.mrb[106].mxu0  ;;  %2409 = vmatprep.mubr.bf16.mxu1 %v2103_v28 }
 0x3bf   : > { %v1933_v34 = vadd.f32 %v1932_v33, %v3897_v9  ;;  %v1934_v35 = vpop.f32.mrb[107].mxu0  ;;  %2410 = vmatmul.mubr.bf16.gmra.mrb[100].mxu1 %v2102_v27  ;;  %v2027_v37 = vmax.f32 %v1929_v30, 0.0 }
 0x3c0   : > { %v1935_v36 = vadd.f32 %v1934_v35, %v3900_v60  ;;  %v2028_v41 = vmax.f32 %v1931_v32, 0.0 }
 0x3c1   : > { %v2029_v39 = vmax.f32 %v1933_v34, 0.0 }
 0x3c2   : > { %v2030_v42 = vmax.f32 %v1935_v36, 0.0 }
 0x3c3   : > { %v2104_v45 = vpack.c.bf16 %v2029_v39, %v2027_v37 }
 0x3c4   : > { %v2105_v46 = vpack.c.bf16 %v2030_v42, %v2028_v41  ;;  %v1938_v47 = vpop.f32.mrb[108].mxu0 }
 0x3c5   : > { %v1939_v48 = vadd.f32 %v1938_v47, %v3897_v9  ;;  %v1940_v49 = vpop.f32.mrb[109].mxu0 }
 0x3c6   : > { %v1941_v50 = vadd.f32 %v1940_v49, %v3900_v60  ;;  %v1942_v51 = vpop.f32.mrb[110].mxu0  ;;  %2419 = vmatprep.mubr.bf16.mxu1 %v2105_v46 }
 0x3c7   : > { %v1943_v52 = vadd.f32 %v1942_v51, %v3897_v9  ;;  %v1944_v53 = vpop.f32.mrb[111].mxu0  ;;  %2420 = vmatmul.mubr.bf16.gmra.mrb[104].mxu1 %v2104_v45  ;;  %v2031_v55 = vmax.f32 %v1939_v48, 0.0 }
 0x3c8   : > { %v1945_v54 = vadd.f32 %v1944_v53, %v3900_v60  ;;  %v2032_v57 = vmax.f32 %v1941_v50, 0.0 }
 0x3c9   : > { %v2033_v56 = vmax.f32 %v1943_v52, 0.0 }
 0x3ca   : > { %v2034_v58 = vmax.f32 %v1945_v54, 0.0 }
 0x3cb   : > { %v2106_v43 = vpack.c.bf16 %v2033_v56, %v2031_v55 }
 0x3cc   : > { %v2107_v44 = vpack.c.bf16 %v2034_v58, %v2032_v57  ;;  %v1948_v59 = vpop.f32.mrb[112].mxu0  ;;  %v2083_v57 = vld [vmem:[%s4165_s8] sm:$0x3] }
 0x3cd   : > { %v1949_v62 = vadd.f32 %v1948_v59, %v3897_v9  ;;  %v1950_v63 = vpop.f32.mrb[113].mxu0  ;;  %v3971_v58 = vrot.slane %v2083_v57, %v3743_v38 }
 0x3ce   : > { %v1951_v0 = vadd.f32 %v1950_v63, %v3900_v60  ;;  %v1952_v1 = vpop.f32.mrb[114].mxu0  ;;  %2429 = vmatprep.mubr.bf16.mxu1 %v2107_v44 }
 0x3cf   : > { %v1953_v2 = vadd.f32 %v1952_v1, %v3897_v9  ;;  %v1954_v3 = vpop.f32.mrb[115].mxu0  ;;  %2430 = vmatmul.mubr.bf16.gmra.mrb[108].mxu1 %v2106_v43  ;;  %v2035_v5 = vmax.f32 %v1949_v62, 0.0 }
 0x3d0   : > { %v1955_v4 = vadd.f32 %v1954_v3, %v3900_v60  ;;  %v2036_v7 = vmax.f32 %v1951_v0, 0.0 }
 0x3d1   : > { %v2037_v6 = vmax.f32 %v1953_v2, 0.0 }
 0x3d2   : > { %v2038_v8 = vmax.f32 %v1955_v4, 0.0 }
 0x3d3   : > { %v2108_v10 = vpack.c.bf16 %v2037_v6, %v2035_v5 }
 0x3d4   : > { %v2109_v61 = vpack.c.bf16 %v2038_v8, %v2036_v7  ;;  %v1958_v11 = vpop.f32.mrb[116].mxu0 }
 0x3d5   : > { %v1959_v12 = vadd.f32 %v1958_v11, %v3897_v9  ;;  %v1960_v13 = vpop.f32.mrb[117].mxu0 }
 0x3d6   : > { %v1961_v14 = vadd.f32 %v1960_v13, %v3900_v60  ;;  %v1962_v15 = vpop.f32.mrb[118].mxu0  ;;  %2439 = vmatprep.mubr.bf16.mxu1 %v2109_v61 }
 0x3d7   : > { %v1963_v16 = vadd.f32 %v1962_v15, %v3897_v9  ;;  %v1964_v17 = vpop.f32.mrb[119].mxu0  ;;  %2440 = vmatmul.mubr.bf16.gmra.mrb[112].mxu1 %v2108_v10  ;;  %v2039_v19 = vmax.f32 %v1959_v12, 0.0 }
 0x3d8   : > { %v1965_v18 = vadd.f32 %v1964_v17, %v3900_v60  ;;  %v2040_v21 = vmax.f32 %v1961_v14, 0.0 }
 0x3d9   : > { %v2041_v20 = vmax.f32 %v1963_v16, 0.0 }
 0x3da   : > { %v2042_v22 = vmax.f32 %v1965_v18, 0.0 }
 0x3db   : > { %v2110_v23 = vpack.c.bf16 %v2041_v20, %v2039_v19 }
 0x3dc   : > { %v2111_v24 = vpack.c.bf16 %v2042_v22, %v2040_v21  ;;  %v1968_v25 = vpop.f32.mrb[120].mxu0 }
 0x3dd   : > { %v1969_v26 = vadd.f32 %v1968_v25, %v3897_v9  ;;  %v1970_v27 = vpop.f32.mrb[121].mxu0 }
 0x3de   : > { %v1971_v28 = vadd.f32 %v1970_v27, %v3900_v60  ;;  %v1972_v29 = vpop.f32.mrb[122].mxu0  ;;  %2449 = vmatprep.mubr.bf16.mxu1 %v2111_v24 }
 0x3df   : > { %v1973_v30 = vadd.f32 %v1972_v29, %v3897_v9  ;;  %v1974_v31 = vpop.f32.mrb[123].mxu0  ;;  %2450 = vmatmul.mubr.bf16.gmra.mrb[116].mxu1 %v2110_v23  ;;  %v2043_v33 = vmax.f32 %v1969_v26, 0.0 }
 0x3e0   : > { %v1975_v32 = vadd.f32 %v1974_v31, %v3900_v60  ;;  %v2044_v35 = vmax.f32 %v1971_v28, 0.0 }
 0x3e1   : > { %v2045_v34 = vmax.f32 %v1973_v30, 0.0 }
 0x3e2   : > { %v2046_v36 = vmax.f32 %v1975_v32, 0.0 }
 0x3e3   : > { %v2112_v37 = vpack.c.bf16 %v2045_v34, %v2043_v33 }
 0x3e4   : > { %v2113_v39 = vpack.c.bf16 %v2046_v36, %v2044_v35  ;;  %v1978_v41 = vpop.f32.mrb[124].mxu0 }
 0x3e5   : > { %v1979_v42 = vadd.f32 %v1978_v41, %v3897_v9  ;;  %v1980_v45 = vpop.f32.mrb[125].mxu0 }
 0x3e6   : > { %v1981_v46 = vadd.f32 %v1980_v45, %v3900_v60  ;;  %v1982_v47 = vpop.f32.mrb[126].mxu0  ;;  %2459 = vmatprep.mubr.bf16.mxu1 %v2113_v39 }
 0x3e7   : > { %v1983_v48 = vadd.f32 %v1982_v47, %v3897_v9  ;;  %v1984_v49 = vpop.f32.mrb[127].mxu0  ;;  %2460 = vmatmul.mubr.bf16.gmra.mrb[120].mxu1 %v2112_v37  ;;  %v2047_v51 = vmax.f32 %v1979_v42, 0.0  ;;  %v3974_v9 = vrot.slane %v2083_v57, %v3748_v40 }
 0x3e8   : > { %v1985_v50 = vadd.f32 %v1984_v49, %v3900_v60  ;;  %v2048_v53 = vmax.f32 %v1981_v46, 0.0 }
 0x3e9   : > { %v2049_v52 = vmax.f32 %v1983_v48, 0.0 }
 0x3ea   : > { %v2050_v54 = vmax.f32 %v1985_v50, 0.0 }
 0x3eb   : > { %v2114_v55 = vpack.c.bf16 %v2049_v52, %v2047_v51 }
 0x3ec   : > { %v2115_v56 = vpack.c.bf16 %v2050_v54, %v2048_v53 }
 0x3ee   : > { %2469 = vmatprep.mubr.bf16.mxu1 %v2115_v56 }
 0x3ef   : > { %2470 = vmatmul.mubr.bf16.gmra.mrb[124].mxu1 %v2114_v55 }
 0x44a   : > { %v2321_v60 = vpop.f32.mrb[64].mxu1 }
 0x44b   : > { %v2322_v43 = vadd.f32 %v2321_v60, %v3971_v58  ;;  %v2323_v44 = vpop.f32.mrb[65].mxu1 }
 0x44c   : > { %v2324_v59 = vadd.f32 %v2323_v44, %v3974_v9  ;;  %v2325_v62 = vpop.f32.mrb[66].mxu1 }
 0x44d   : > { %2480 = vst [vmem:[%s3978_s16] sm:$0xff] %v2322_v43  ;;  %v2326_v38 = vadd.f32 %v2325_v62, %v3971_v58  ;;  %v2327_v40 = vpop.f32.mrb[67].mxu1 }
 0x44e   : > { %2481 = vst [vmem:[%s3978_s16 + $0x8] sm:$0xff] %v2324_v59  ;;  %v2328_v63 = vadd.f32 %v2327_v40, %v3974_v9 }
 0x44f   : > { %2482 = vst [vmem:[%s3978_s16 + $0x10] sm:$0xff] %v2326_v38 }
 0x450   : > { %2483 = vst [vmem:[%s3978_s16 + $0x18] sm:$0xff] %v2328_v63 }
 0x452   : > { %v2331_v0 = vpop.f32.mrb[68].mxu1 }
 0x453   : > { %v2332_v1 = vadd.f32 %v2331_v0, %v3971_v58  ;;  %v2333_v2 = vpop.f32.mrb[69].mxu1 }
 0x454   : > { %v2334_v3 = vadd.f32 %v2333_v2, %v3974_v9  ;;  %v2335_v4 = vpop.f32.mrb[70].mxu1 }
 0x455   : > { %2484 = vst [vmem:[%s3978_s16 + $0x20] sm:$0xff] %v2332_v1  ;;  %v2336_v5 = vadd.f32 %v2335_v4, %v3971_v58  ;;  %v2337_v6 = vpop.f32.mrb[71].mxu1 }
 0x456   : > { %2485 = vst [vmem:[%s3978_s16 + $0x28] sm:$0xff] %v2334_v3  ;;  %v2338_v7 = vadd.f32 %v2337_v6, %v3974_v9 }
 0x457   : > { %2486 = vst [vmem:[%s3978_s16 + $0x30] sm:$0xff] %v2336_v5 }
 0x458   : > { %2487 = vst [vmem:[%s3978_s16 + $0x38] sm:$0xff] %v2338_v7 }
 0x45a   : > { %v2341_v8 = vpop.f32.mrb[72].mxu1 }
 0x45b   : > { %v2342_v10 = vadd.f32 %v2341_v8, %v3971_v58  ;;  %v2343_v61 = vpop.f32.mrb[73].mxu1 }
 0x45c   : > { %v2344_v11 = vadd.f32 %v2343_v61, %v3974_v9  ;;  %v2345_v12 = vpop.f32.mrb[74].mxu1 }
 0x45d   : > { %2488 = vst [vmem:[%s3978_s16 + $0x40] sm:$0xff] %v2342_v10  ;;  %v2346_v13 = vadd.f32 %v2345_v12, %v3971_v58  ;;  %v2347_v14 = vpop.f32.mrb[75].mxu1 }
 0x45e   : > { %2489 = vst [vmem:[%s3978_s16 + $0x48] sm:$0xff] %v2344_v11  ;;  %v2348_v15 = vadd.f32 %v2347_v14, %v3974_v9 }
 0x45f   : > { %2490 = vst [vmem:[%s3978_s16 + $0x50] sm:$0xff] %v2346_v13 }
 0x460   : > { %2491 = vst [vmem:[%s3978_s16 + $0x58] sm:$0xff] %v2348_v15 }
 0x462   : > { %v2351_v16 = vpop.f32.mrb[76].mxu1 }
 0x463   : > { %v2352_v17 = vadd.f32 %v2351_v16, %v3971_v58  ;;  %v2353_v18 = vpop.f32.mrb[77].mxu1 }
 0x464   : > { %v2354_v19 = vadd.f32 %v2353_v18, %v3974_v9  ;;  %v2355_v20 = vpop.f32.mrb[78].mxu1 }
 0x465   : > { %2492 = vst [vmem:[%s3978_s16 + $0x60] sm:$0xff] %v2352_v17  ;;  %v2356_v21 = vadd.f32 %v2355_v20, %v3971_v58  ;;  %v2357_v22 = vpop.f32.mrb[79].mxu1 }
 0x466   : > { %2493 = vst [vmem:[%s3978_s16 + $0x68] sm:$0xff] %v2354_v19  ;;  %v2358_v23 = vadd.f32 %v2357_v22, %v3974_v9 }
 0x467   : > { %2494 = vst [vmem:[%s3978_s16 + $0x70] sm:$0xff] %v2356_v21 }
 0x468   : > { %2495 = vst [vmem:[%s3978_s16 + $0x78] sm:$0xff] %v2358_v23 }
 0x46a   : > { %v2361_v24 = vpop.f32.mrb[80].mxu1 }
 0x46b   : > { %v2362_v25 = vadd.f32 %v2361_v24, %v3971_v58  ;;  %v2363_v26 = vpop.f32.mrb[81].mxu1 }
 0x46c   : > { %v2364_v27 = vadd.f32 %v2363_v26, %v3974_v9  ;;  %v2365_v28 = vpop.f32.mrb[82].mxu1 }
 0x46d   : > { %2496 = vst [vmem:[%s3978_s16 + $0x80] sm:$0xff] %v2362_v25  ;;  %v2366_v29 = vadd.f32 %v2365_v28, %v3971_v58  ;;  %v2367_v30 = vpop.f32.mrb[83].mxu1 }
 0x46e   : > { %2497 = vst [vmem:[%s3978_s16 + $0x88] sm:$0xff] %v2364_v27  ;;  %v2368_v31 = vadd.f32 %v2367_v30, %v3974_v9 }
 0x46f   : > { %2498 = vst [vmem:[%s3978_s16 + $0x90] sm:$0xff] %v2366_v29 }
 0x470   : > { %2499 = vst [vmem:[%s3978_s16 + $0x98] sm:$0xff] %v2368_v31 }
 0x472   : > { %v2371_v32 = vpop.f32.mrb[84].mxu1 }
 0x473   : > { %v2372_v33 = vadd.f32 %v2371_v32, %v3971_v58  ;;  %v2373_v34 = vpop.f32.mrb[85].mxu1 }
 0x474   : > { %v2374_v35 = vadd.f32 %v2373_v34, %v3974_v9  ;;  %v2375_v36 = vpop.f32.mrb[86].mxu1 }
 0x475   : > { %2500 = vst [vmem:[%s3978_s16 + $0xa0] sm:$0xff] %v2372_v33  ;;  %v2376_v37 = vadd.f32 %v2375_v36, %v3971_v58  ;;  %v2377_v39 = vpop.f32.mrb[87].mxu1 }
 0x476   : > { %2501 = vst [vmem:[%s3978_s16 + $0xa8] sm:$0xff] %v2374_v35  ;;  %v2378_v41 = vadd.f32 %v2377_v39, %v3974_v9 }
 0x477   : > { %2502 = vst [vmem:[%s3978_s16 + $0xb0] sm:$0xff] %v2376_v37 }
 0x478   : > { %2503 = vst [vmem:[%s3978_s16 + $0xb8] sm:$0xff] %v2378_v41 }
 0x47a   : > { %v2381_v42 = vpop.f32.mrb[88].mxu1 }
 0x47b   : > { %v2382_v45 = vadd.f32 %v2381_v42, %v3971_v58  ;;  %v2383_v46 = vpop.f32.mrb[89].mxu1 }
 0x47c   : > { %v2384_v47 = vadd.f32 %v2383_v46, %v3974_v9  ;;  %v2385_v48 = vpop.f32.mrb[90].mxu1 }
 0x47d   : > { %2504 = vst [vmem:[%s3978_s16 + $0xc0] sm:$0xff] %v2382_v45  ;;  %v2386_v49 = vadd.f32 %v2385_v48, %v3971_v58  ;;  %v2387_v50 = vpop.f32.mrb[91].mxu1 }
 0x47e   : > { %2505 = vst [vmem:[%s3978_s16 + $0xc8] sm:$0xff] %v2384_v47  ;;  %v2388_v51 = vadd.f32 %v2387_v50, %v3974_v9 }
 0x47f   : > { %2506 = vst [vmem:[%s3978_s16 + $0xd0] sm:$0xff] %v2386_v49 }
 0x480   : > { %2507 = vst [vmem:[%s3978_s16 + $0xd8] sm:$0xff] %v2388_v51 }
 0x482   : > { %v2391_v52 = vpop.f32.mrb[92].mxu1 }
 0x483   : > { %v2392_v53 = vadd.f32 %v2391_v52, %v3971_v58  ;;  %v2393_v54 = vpop.f32.mrb[93].mxu1 }
 0x484   : > { %v2394_v55 = vadd.f32 %v2393_v54, %v3974_v9  ;;  %v2395_v56 = vpop.f32.mrb[94].mxu1 }
 0x485   : > { %2508 = vst [vmem:[%s3978_s16 + $0xe0] sm:$0xff] %v2392_v53  ;;  %v2396_v57 = vadd.f32 %v2395_v56, %v3971_v58  ;;  %v2397_v60 = vpop.f32.mrb[95].mxu1 }
 0x486   : > { %2509 = vst [vmem:[%s3978_s16 + $0xe8] sm:$0xff] %v2394_v55  ;;  %v2398_v43 = vadd.f32 %v2397_v60, %v3974_v9 }
 0x487   : > { %2510 = vst [vmem:[%s3978_s16 + $0xf0] sm:$0xff] %v2396_v57 }
 0x488   : > { %2511 = vst [vmem:[%s3978_s16 + $0xf8] sm:$0xff] %v2398_v43 }
 0x48a   : > { %v2401_v44 = vpop.f32.mrb[96].mxu1 }
 0x48b   : > { %v2402_v59 = vadd.f32 %v2401_v44, %v3971_v58  ;;  %v2403_v62 = vpop.f32.mrb[97].mxu1 }
 0x48c   : > { %v2404_v38 = vadd.f32 %v2403_v62, %v3974_v9  ;;  %v2405_v40 = vpop.f32.mrb[98].mxu1 }
 0x48d   : > { %2512 = vst [vmem:[%s3978_s16 + $0x100] sm:$0xff] %v2402_v59  ;;  %v2406_v63 = vadd.f32 %v2405_v40, %v3971_v58  ;;  %v2407_v0 = vpop.f32.mrb[99].mxu1 }
 0x48e   : > { %2513 = vst [vmem:[%s3978_s16 + $0x108] sm:$0xff] %v2404_v38  ;;  %v2408_v1 = vadd.f32 %v2407_v0, %v3974_v9 }
 0x48f   : > { %2514 = vst [vmem:[%s3978_s16 + $0x110] sm:$0xff] %v2406_v63 }
 0x490   : > { %2515 = vst [vmem:[%s3978_s16 + $0x118] sm:$0xff] %v2408_v1 }
 0x492   : > { %v2411_v2 = vpop.f32.mrb[100].mxu1 }
 0x493   : > { %v2412_v3 = vadd.f32 %v2411_v2, %v3971_v58  ;;  %v2413_v4 = vpop.f32.mrb[101].mxu1 }
 0x494   : > { %v2414_v5 = vadd.f32 %v2413_v4, %v3974_v9  ;;  %v2415_v6 = vpop.f32.mrb[102].mxu1 }
 0x495   : > { %2516 = vst [vmem:[%s3978_s16 + $0x120] sm:$0xff] %v2412_v3  ;;  %v2416_v7 = vadd.f32 %v2415_v6, %v3971_v58  ;;  %v2417_v8 = vpop.f32.mrb[103].mxu1 }
 0x496   : > { %2517 = vst [vmem:[%s3978_s16 + $0x128] sm:$0xff] %v2414_v5  ;;  %v2418_v10 = vadd.f32 %v2417_v8, %v3974_v9 }
 0x497   : > { %2518 = vst [vmem:[%s3978_s16 + $0x130] sm:$0xff] %v2416_v7 }
 0x498   : > { %2519 = vst [vmem:[%s3978_s16 + $0x138] sm:$0xff] %v2418_v10 }
 0x49a   : > { %v2421_v61 = vpop.f32.mrb[104].mxu1 }
 0x49b   : > { %v2422_v11 = vadd.f32 %v2421_v61, %v3971_v58  ;;  %v2423_v12 = vpop.f32.mrb[105].mxu1 }
 0x49c   : > { %v2424_v13 = vadd.f32 %v2423_v12, %v3974_v9  ;;  %v2425_v14 = vpop.f32.mrb[106].mxu1 }
 0x49d   : > { %2520 = vst [vmem:[%s3978_s16 + $0x140] sm:$0xff] %v2422_v11  ;;  %v2426_v15 = vadd.f32 %v2425_v14, %v3971_v58  ;;  %v2427_v16 = vpop.f32.mrb[107].mxu1 }
 0x49e   : > { %2521 = vst [vmem:[%s3978_s16 + $0x148] sm:$0xff] %v2424_v13  ;;  %v2428_v17 = vadd.f32 %v2427_v16, %v3974_v9 }
 0x49f   : > { %2522 = vst [vmem:[%s3978_s16 + $0x150] sm:$0xff] %v2426_v15 }
 0x4a0   : > { %2523 = vst [vmem:[%s3978_s16 + $0x158] sm:$0xff] %v2428_v17 }
 0x4a2   : > { %v2431_v18 = vpop.f32.mrb[108].mxu1 }
 0x4a3   : > { %v2432_v19 = vadd.f32 %v2431_v18, %v3971_v58  ;;  %v2433_v20 = vpop.f32.mrb[109].mxu1 }
 0x4a4   : > { %v2434_v21 = vadd.f32 %v2433_v20, %v3974_v9  ;;  %v2435_v22 = vpop.f32.mrb[110].mxu1 }
 0x4a5   : > { %2524 = vst [vmem:[%s3978_s16 + $0x160] sm:$0xff] %v2432_v19  ;;  %v2436_v23 = vadd.f32 %v2435_v22, %v3971_v58  ;;  %v2437_v24 = vpop.f32.mrb[111].mxu1 }
 0x4a6   : > { %2525 = vst [vmem:[%s3978_s16 + $0x168] sm:$0xff] %v2434_v21  ;;  %v2438_v25 = vadd.f32 %v2437_v24, %v3974_v9 }
 0x4a7   : > { %2526 = vst [vmem:[%s3978_s16 + $0x170] sm:$0xff] %v2436_v23 }
 0x4a8   : > { %2527 = vst [vmem:[%s3978_s16 + $0x178] sm:$0xff] %v2438_v25 }
 0x4aa   : > { %v2441_v26 = vpop.f32.mrb[112].mxu1 }
 0x4ab   : > { %v2442_v27 = vadd.f32 %v2441_v26, %v3971_v58  ;;  %v2443_v28 = vpop.f32.mrb[113].mxu1 }
 0x4ac   : > { %v2444_v29 = vadd.f32 %v2443_v28, %v3974_v9  ;;  %v2445_v30 = vpop.f32.mrb[114].mxu1 }
 0x4ad   : > { %2528 = vst [vmem:[%s3978_s16 + $0x180] sm:$0xff] %v2442_v27  ;;  %v2446_v31 = vadd.f32 %v2445_v30, %v3971_v58  ;;  %v2447_v32 = vpop.f32.mrb[115].mxu1 }
 0x4ae   : > { %2529 = vst [vmem:[%s3978_s16 + $0x188] sm:$0xff] %v2444_v29  ;;  %v2448_v33 = vadd.f32 %v2447_v32, %v3974_v9 }
 0x4af   : > { %2530 = vst [vmem:[%s3978_s16 + $0x190] sm:$0xff] %v2446_v31 }
 0x4b0   : > { %2531 = vst [vmem:[%s3978_s16 + $0x198] sm:$0xff] %v2448_v33 }
 0x4b2   : > { %v2451_v34 = vpop.f32.mrb[116].mxu1 }
 0x4b3   : > { %v2452_v35 = vadd.f32 %v2451_v34, %v3971_v58  ;;  %v2453_v36 = vpop.f32.mrb[117].mxu1 }
 0x4b4   : > { %v2454_v37 = vadd.f32 %v2453_v36, %v3974_v9  ;;  %v2455_v39 = vpop.f32.mrb[118].mxu1 }
 0x4b5   : > { %2532 = vst [vmem:[%s3978_s16 + $0x1a0] sm:$0xff] %v2452_v35  ;;  %v2456_v41 = vadd.f32 %v2455_v39, %v3971_v58  ;;  %v2457_v42 = vpop.f32.mrb[119].mxu1 }
 0x4b6   : > { %2533 = vst [vmem:[%s3978_s16 + $0x1a8] sm:$0xff] %v2454_v37  ;;  %v2458_v45 = vadd.f32 %v2457_v42, %v3974_v9 }
 0x4b7   : > { %2534 = vst [vmem:[%s3978_s16 + $0x1b0] sm:$0xff] %v2456_v41 }
 0x4b8   : > { %2535 = vst [vmem:[%s3978_s16 + $0x1b8] sm:$0xff] %v2458_v45 }
 0x4ba   : > { %v2461_v46 = vpop.f32.mrb[120].mxu1 }
 0x4bb   : > { %v2462_v47 = vadd.f32 %v2461_v46, %v3971_v58  ;;  %v2463_v48 = vpop.f32.mrb[121].mxu1 }
 0x4bc   : > { %v2464_v49 = vadd.f32 %v2463_v48, %v3974_v9  ;;  %v2465_v50 = vpop.f32.mrb[122].mxu1 }
 0x4bd   : > { %2536 = vst [vmem:[%s3978_s16 + $0x1c0] sm:$0xff] %v2462_v47  ;;  %v2466_v51 = vadd.f32 %v2465_v50, %v3971_v58  ;;  %v2467_v52 = vpop.f32.mrb[123].mxu1 }
 0x4be   : > { %2537 = vst [vmem:[%s3978_s16 + $0x1c8] sm:$0xff] %v2464_v49  ;;  %v2468_v53 = vadd.f32 %v2467_v52, %v3974_v9 }
 0x4bf   : > { %2538 = vst [vmem:[%s3978_s16 + $0x1d0] sm:$0xff] %v2466_v51 }
 0x4c0   : > { %2539 = vst [vmem:[%s3978_s16 + $0x1d8] sm:$0xff] %v2468_v53 }
 0x4c2   : > { %v2471_v54 = vpop.f32.mrb[124].mxu1 }
 0x4c3   : > { %v2472_v55 = vadd.f32 %v2471_v54, %v3971_v58  ;;  %v2473_v56 = vpop.f32.mrb[125].mxu1 }
 0x4c4   : > { %v2474_v57 = vadd.f32 %v2473_v56, %v3974_v9  ;;  %v2475_v60 = vpop.f32.mrb[126].mxu1 }
 0x4c5   : > { %2540 = vst [vmem:[%s3978_s16 + $0x1e0] sm:$0xff] %v2472_v55  ;;  %v2476_v43 = vadd.f32 %v2475_v60, %v3971_v58  ;;  %v2477_v44 = vpop.f32.mrb[127].mxu1 }
 0x4c6   : > { %2541 = vst [vmem:[%s3978_s16 + $0x1e8] sm:$0xff] %v2474_v57  ;;  %v2478_v59 = vadd.f32 %v2477_v44, %v3974_v9 }
 0x4c7   : > { %2542 = vst [vmem:[%s3978_s16 + $0x1f0] sm:$0xff] %v2476_v43 }
 0x4c8   : > { %2543 = vst [vmem:[%s3978_s16 + $0x1f8] sm:$0xff] %v2478_v59 }
 0x4c9   : > { %3344 = shalt.err (!%p3341_p13)
}
 0x4ca   : > { %s3345_s9 = scalar_lea.hbm %s4107_s17, 8192  ;;  %s3349_s16 = scalar_lea.hbm %s4190_s15, 16384 }
 0x4cb   : > { %p3346_p9 = scmp.ne.s32.totalorder %s4107_s17, %s3345_s9  ;;  %p3350_p4 = scmp.lt.u32.totalorder %s4107_s17, %s4190_s15 }
 0x4cc   : > { %p3351_p8 = scmp.lt.u32.totalorder %s3349_s16, %s3345_s9  ;;  %p3353_p3 = scmp.lt.u32.totalorder %s3345_s9, %s4107_s17 }
 0x4cd   : > { %p3347_p0 = pnand %p3346_p9, %p3638_p10 }
 0x4ce   : > { %p3352_p6 = por %p3351_p8, %p3350_p4 }
 0x4cf   : > { %p3348_p11 = pneg %p3347_p0 }
 0x4d0   : > { %p3354_p5 = por %p3353_p3, %p3352_p6 }
 0x4d2   : > { %p3355_p7 = pnand %p3354_p5, %p3348_p11 }
 0x4d4   : > { %3358 = shalt.err (!%p3355_p7)
}
 0x4d5   : > { %s3415_s29 = smov 256   ;;  %s3416_s25 = smov 16  }
 0x4d6   : > { %2876 = dma.vmem_to_hbm [thread:$0]  (%p3638_p10), %s4109_s21, 8192, %s4107_s17, %s2545_s13, %s3415_s29, %s3415_s29, %s3416_s25  }
 0x4d7 PF: > { %s4191_s26 = sld [smem:[#allocation16_spill]]  ;;  %s4192_s19 = sld [smem:[#allocation17_spill]] }
 0x4d8   : > { %p4194_p1 = scmp.ge.s32.totalorder %s3405_s12, 2 }
 0x4dd   : > { %s2574_s22 = sand.u32 1, %s4191_s26   ;;  %p4193_p12 = scmp.ne.s32.totalorder %s4192_s19, 0 }
 0x4de   : > { %s2575_s9 = scalar_lea.sflag [#allocation4], %s2574_s22 }
 0x4df   : > { %p2896_p2 = pnand %p4194_p1, %p4193_p12 }
 0x4e1   : > { %3388 = dma.done.wait (!%p2896_p2), %s2575_s9, 8192  }
 0x4e2   : > { %3390 = vsyncadd (!%p2896_p2), %s2575_s9, 4294959104  ;;  %p24_p13 = scmp.ge.s32.totalorder %s3628_s14, 4   ;;  %s4195_s30 = smov %s3397_s10 }
 0x4e3   : > { %s4196_s10 = smov %s3401_s11  ;;  %s4197_s11 = smov %s3644_s28 }
 0x4e4   : > { %s4198_s12 = smov %s3628_s14  ;;  %26 = sbr.rel (!%p24_p13) target bundleno = 9 (0x9), region = 117 }
 0x4eb   :  { %2580 = vsyncpa [#allocation3], 1 }
 0x4ec   :  { %2582 = vsyncpa [#allocation3 + $0x1], 1 }
 0x4ed   :  { %2583 = vsyncpa [#allocation6], 1 }
 0x4ee   :  { %2584 = vsyncpa [#allocation9], 1 }
 0x4ef   :  { %2585 = vsyncpa [#allocation4], 1 }
 0x4f0   :  { %2587 = vsyncpa [#allocation4 + $0x1], 1 }

</bundles_post_ra>
